<compile_context>
chip_gen: v5e
topology: v5e:2x2
jax: 0.10.0
libtpu: 0.0.40
codegen_flags: <defaults>
</compile_context>

<pallas_src>
import functools

import jax
import jax.numpy as jnp
from jax.experimental import pallas as pl
from jax.experimental.pallas import tpu as pltpu


# ----------------------------- Pallas kernel --------------------------------

def _fused_lstm_fc_kernel(*refs, num_layers, hidden_size, seq_len, batch):
    """Fused multi-layer LSTM + final Linear, everything resident in VMEM/vregs.

    refs layout (Pallas passes inputs..., outputs...):
      [0]                     x_ref     (T*B, I)    time-major, pre-flattened
      [1 + 3l .. 3 + 3l]      per layer l:
                                wih (I_l, 4H)  g-block pre-scaled by 2
                                whh (H,  4H)   g-block pre-scaled by 2
                                b   (1,  4H)   (b_ih + b_hh), g-block pre-scaled
      [1 + 3L]                fc_w_ref  (1, H)
      [2 + 3L]                fc_b_ref  (1, 1)
      [3 + 3L]                out_ref   (B, 1)
    """
    H, T, B = hidden_size, seq_len, batch

    x_ref = refs[0]
    layer_refs = [(refs[1 + 3 * l], refs[2 + 3 * l], refs[3 + 3 * l])
                  for l in range(num_layers)]
    fc_w_ref = refs[1 + 3 * num_layers]
    fc_b_ref = refs[2 + 3 * num_layers]
    out_ref = refs[3 + 3 * num_layers]

    xin = x_ref[...]                               # (T*B, I) traced value
    h_last = jnp.zeros((B, H), jnp.float32)

    for layer, (wih_ref, whh_ref, b_ref) in enumerate(layer_refs):
        # ---- Hoisted input projection: one (T*B, I_l) x (I_l, 4H) matmul ----
        # for all timesteps; only h @ W_hh stays on the sequential path.
        proj = (jnp.dot(xin, wih_ref[...],
                        preferred_element_type=jnp.float32)
                + b_ref[...])                      # (T*B, 4H), stays in vregs

        whh = whh_ref[...]                         # (H, 4H), loaded once/layer
        is_last = layer == num_layers - 1

        h = jnp.zeros((B, H), jnp.float32)
        c = jnp.zeros((B, H), jnp.float32)
        hs = []

        # T is small & static -> fully unrolled in-kernel time loop.
        for t in range(T):
            gates = proj[t * B:(t + 1) * B, :] + jnp.dot(
                h, whh, preferred_element_type=jnp.float32)   # (B, 4H)
            # Single full-width EUP pass: g-gate pre-activation was pre-scaled
            # by 2 in the wrapper, so tanh(z) = 2*sigmoid(2z) - 1.
            sig = jax.nn.sigmoid(gates)
            i_g = sig[:, 0 * H:1 * H]
            f_g = sig[:, 1 * H:2 * H]
            g_g = 2.0 * sig[:, 2 * H:3 * H] - 1.0
            o_g = sig[:, 3 * H:4 * H]
            c = f_g * c + i_g * g_g
            h = o_g * jnp.tanh(c)
            if not is_last:
                hs.append(h)                       # stays live in vregs

        if not is_last:
            xin = jnp.concatenate(hs, axis=0)      # (T*B, H) for next layer
        h_last = h

    # Final Linear(hidden_size, 1): VPU multiply + lane reduction (no N=1 MXU
    # matmul in the tail).  Single tiny (B, 1) store at the very end.
    out_ref[...] = (jnp.sum(h_last * fc_w_ref[...], axis=-1, keepdims=True)
                    + fc_b_ref[...])


# ------------------------------- Wrapper -------------------------------------

def lstm_model_forward(x, params):
    """x: (B, T, I) batch-first, as in the PyTorch module. Returns (B, 1)."""
    B, T, I = x.shape
    num_layers = len(params["lstm"])
    H = params["lstm"][0][1].shape[1]              # w_hh: (4H, H)

    # All layout plumbing in the wrapper (free XLA reshapes): time-major then
    # flatten so the kernel's projection matmul is fed directly.
    x_flat = jnp.transpose(x, (1, 0, 2)).reshape(T * B, I).astype(jnp.float32)

    # Pre-scale the g-gate (3rd) block of W_ih / W_hh / bias by 2 so the kernel
    # needs only one sigmoid pass per step (tanh(z) = 2*sigmoid(2z) - 1).
    gate_scale = jnp.concatenate([
        jnp.ones((2 * H,), jnp.float32),
        jnp.full((H,), 2.0, jnp.float32),
        jnp.ones((H,), jnp.float32),
    ])

    inputs = [x_flat]
    vmem_spec = pl.BlockSpec(memory_space=pltpu.MemorySpace.VMEM)
    in_specs = [vmem_spec]
    for (w_ih, w_hh, b_ih, b_hh) in params["lstm"]:
        inputs.append(jnp.transpose(w_ih * gate_scale[:, None]))      # (I_l, 4H)
        inputs.append(jnp.transpose(w_hh * gate_scale[:, None]))      # (H, 4H)
        inputs.append(((b_ih + b_hh) * gate_scale).reshape(1, 4 * H)) # (1, 4H)
        in_specs += [vmem_spec, vmem_spec, vmem_spec]
    inputs.append(params["fc_w"].reshape(1, H).astype(jnp.float32))   # (1, H)
    inputs.append(params["fc_b"].reshape(1, 1).astype(jnp.float32))   # (1, 1)
    in_specs += [vmem_spec, vmem_spec]

    kernel = functools.partial(_fused_lstm_fc_kernel,
                               num_layers=num_layers, hidden_size=H,
                               seq_len=T, batch=B)

    return pl.pallas_call(
        kernel,
        out_shape=jax.ShapeDtypeStruct((B, 1), jnp.float32),
        in_specs=in_specs,
        out_specs=vmem_spec,
    )(*inputs)


# --------------------------- Reference (pure JAX) ----------------------------

def lstm_model_ref(x, params):
    B, T, _ = x.shape
    layer_in = x
    for (w_ih, w_hh, b_ih, b_hh) in params["lstm"]:
        H = w_hh.shape[1]

        def step(carry, x_t):
            h, c = carry
            gates = x_t @ w_ih.T + h @ w_hh.T + b_ih + b_hh
            i = jax.nn.sigmoid(gates[:, 0 * H:1 * H])
            f = jax.nn.sigmoid(gates[:, 1 * H:2 * H])
            g = jnp.tanh(gates[:, 2 * H:3 * H])
            o = jax.nn.sigmoid(gates[:, 3 * H:4 * H])
            c = f * c + i * g
            h = o * jnp.tanh(c)
            return (h, c), h

        h0 = jnp.zeros((B, H), jnp.float32)
        c0 = jnp.zeros((B, H), jnp.float32)
        _, hs = jax.lax.scan(step, (h0, c0), jnp.transpose(layer_in, (1, 0, 2)))
        layer_in = jnp.transpose(hs, (1, 0, 2))
    return layer_in[:, -1, :] @ params["fc_w"].T + params["fc_b"]


# ------------------------------ Param init -----------------------------------

def init_params(key, input_size, hidden_size, num_layers):
    """Deterministic init matching PyTorch shapes: U(-1/sqrt(H), 1/sqrt(H))."""
    bound = 1.0 / jnp.sqrt(jnp.float32(hidden_size))
    lstm_params = []
    for layer in range(num_layers):
        in_sz = input_size if layer == 0 else hidden_size
        key, k1, k2, k3, k4 = jax.random.split(key, 5)
        w_ih = jax.random.uniform(k1, (4 * hidden_size, in_sz), jnp.float32,
                                  -bound, bound)
        w_hh = jax.random.uniform(k2, (4 * hidden_size, hidden_size), jnp.float32,
                                  -bound, bound)
        b_ih = jax.random.uniform(k3, (4 * hidden_size,), jnp.float32, -bound, bound)
        b_hh = jax.random.uniform(k4, (4 * hidden_size,), jnp.float32, -bound, bound)
        lstm_params.append((w_ih, w_hh, b_ih, b_hh))
    key, k5, k6 = jax.random.split(key, 3)
    fc_w = jax.random.uniform(k5, (1, hidden_size), jnp.float32, -bound, bound)
    fc_b = jax.random.uniform(k6, (1,), jnp.float32, -bound, bound)
    return {"lstm": lstm_params, "fc_w": fc_w, "fc_b": fc_b}


# --------------------------------- Main ---------------------------------------

if __name__ == "__main__":
    B, T, INPUT_SIZE, HIDDEN_SIZE, NUM_LAYERS = 8, 8, 16, 32, 2

    key = jax.random.PRNGKey(0)
    key, xk = jax.random.split(key)
    x = jax.random.normal(xk, (B, T, INPUT_SIZE), jnp.float32)   # (B, T, I)
    params = init_params(key, INPUT_SIZE, HIDDEN_SIZE, NUM_LAYERS)

    fwd = jax.jit(lstm_model_forward)
    out = jax.block_until_ready(fwd(x, params))

    ref = jax.block_until_ready(lstm_model_ref(x, params))
    assert out.shape == (B, 1), out.shape
    assert jnp.allclose(out, ref, atol=1e-4, rtol=1e-4), (
        f"mismatch: max abs diff {jnp.max(jnp.abs(out - ref))}")

    print("KERNEL_OK")
</pallas_src>

<mosaic_0001>
module attributes {stable_mosaic.version = 11 : i64} {
  func.func @_fused_lstm_fc_kernel(%arg0: memref<64x16xf32, #tpu.memory_space<vmem>>, %arg1: memref<16x128xf32, #tpu.memory_space<vmem>>, %arg2: memref<32x128xf32, #tpu.memory_space<vmem>>, %arg3: memref<1x128xf32, #tpu.memory_space<vmem>>, %arg4: memref<32x128xf32, #tpu.memory_space<vmem>>, %arg5: memref<32x128xf32, #tpu.memory_space<vmem>>, %arg6: memref<1x128xf32, #tpu.memory_space<vmem>>, %arg7: memref<1x32xf32, #tpu.memory_space<vmem>>, %arg8: memref<1x1xf32, #tpu.memory_space<vmem>>, %arg9: memref<8x1xf32, #tpu.memory_space<vmem>>) attributes {dimension_semantics = [], scalar_prefetch = 0 : i64, scratch_operands = 0 : i64, tpu.core_type = #tpu.core_type<tc>} {
    %c0 = arith.constant 0 : index
    %c0_0 = arith.constant 0 : index
    %0 = vector.load %arg0[%c0, %c0_0] : memref<64x16xf32, #tpu.memory_space<vmem>>, vector<64x16xf32>
    %c0_1 = arith.constant 0 : index
    %c0_2 = arith.constant 0 : index
    %1 = vector.load %arg1[%c0_1, %c0_2] : memref<16x128xf32, #tpu.memory_space<vmem>>, vector<16x128xf32>
    %cst = arith.constant dense<0.000000e+00> : vector<64x128xf32>
    %2 = tpu.matmul %0, %1, %cst {dimension_numbers = #tpu.dot_dimension_numbers<[1], [0], [0], [1], [0, 0, 1, 1], [], []>} : vector<64x16xf32>, vector<16x128xf32>, vector<64x128xf32> -> vector<64x128xf32>
    %c0_3 = arith.constant 0 : index
    %c0_4 = arith.constant 0 : index
    %3 = vector.load %arg3[%c0_3, %c0_4] : memref<1x128xf32, #tpu.memory_space<vmem>>, vector<1x128xf32>
    %4 = vector.broadcast %3 : vector<1x128xf32> to vector<64x128xf32>
    %5 = arith.addf %2, %4 : vector<64x128xf32>
    %c0_5 = arith.constant 0 : index
    %c0_6 = arith.constant 0 : index
    %6 = vector.load %arg2[%c0_5, %c0_6] : memref<32x128xf32, #tpu.memory_space<vmem>>, vector<32x128xf32>
    %cst_7 = arith.constant 0.000000e+00 : f32
    %7 = vector.broadcast %cst_7 : f32 to vector<8x32xf32>
    %cst_8 = arith.constant 0.000000e+00 : f32
    %8 = vector.broadcast %cst_8 : f32 to vector<8x32xf32>
    %9 = vector.extract_strided_slice %5 {offsets = [0, 0], sizes = [8, 128], strides = [1, 1]} : vector<64x128xf32> to vector<8x128xf32>
    %cst_9 = arith.constant dense<0.000000e+00> : vector<8x128xf32>
    %10 = tpu.matmul %7, %6, %cst_9 {dimension_numbers = #tpu.dot_dimension_numbers<[1], [0], [0], [1], [0, 0, 1, 1], [], []>} : vector<8x32xf32>, vector<32x128xf32>, vector<8x128xf32> -> vector<8x128xf32>
    %11 = arith.addf %9, %10 : vector<8x128xf32>
    %12 = arith.negf %11 : vector<8x128xf32>
    %13 = math.exp %12 : vector<8x128xf32>
    %cst_10 = arith.constant 1.000000e+00 : f32
    %14 = vector.broadcast %cst_10 : f32 to vector<8x128xf32>
    %15 = arith.addf %14, %13 : vector<8x128xf32>
    %16 = arith.divf %14, %15 : vector<8x128xf32>
    %17 = vector.extract_strided_slice %16 {offsets = [0, 0], sizes = [8, 32], strides = [1, 1]} : vector<8x128xf32> to vector<8x32xf32>
    %18 = vector.extract_strided_slice %16 {offsets = [0, 32], sizes = [8, 32], strides = [1, 1]} : vector<8x128xf32> to vector<8x32xf32>
    %19 = vector.extract_strided_slice %16 {offsets = [0, 64], sizes = [8, 32], strides = [1, 1]} : vector<8x128xf32> to vector<8x32xf32>
    %cst_11 = arith.constant 2.000000e+00 : f32
    %20 = vector.broadcast %cst_11 : f32 to vector<8x32xf32>
    %21 = arith.mulf %20, %19 : vector<8x32xf32>
    %cst_12 = arith.constant 1.000000e+00 : f32
    %22 = vector.broadcast %cst_12 : f32 to vector<8x32xf32>
    %23 = arith.subf %21, %22 : vector<8x32xf32>
    %24 = vector.extract_strided_slice %16 {offsets = [0, 96], sizes = [8, 32], strides = [1, 1]} : vector<8x128xf32> to vector<8x32xf32>
    %25 = arith.mulf %18, %8 : vector<8x32xf32>
    %26 = arith.mulf %17, %23 : vector<8x32xf32>
    %27 = arith.addf %25, %26 : vector<8x32xf32>
    %28 = math.tanh %27 : vector<8x32xf32>
    %29 = arith.mulf %24, %28 : vector<8x32xf32>
    %30 = vector.extract_strided_slice %5 {offsets = [8, 0], sizes = [8, 128], strides = [1, 1]} : vector<64x128xf32> to vector<8x128xf32>
    %cst_13 = arith.constant dense<0.000000e+00> : vector<8x128xf32>
    %31 = tpu.matmul %29, %6, %cst_13 {dimension_numbers = #tpu.dot_dimension_numbers<[1], [0], [0], [1], [0, 0, 1, 1], [], []>} : vector<8x32xf32>, vector<32x128xf32>, vector<8x128xf32> -> vector<8x128xf32>
    %32 = arith.addf %30, %31 : vector<8x128xf32>
    %33 = arith.negf %32 : vector<8x128xf32>
    %34 = math.exp %33 : vector<8x128xf32>
    %cst_14 = arith.constant 1.000000e+00 : f32
    %35 = vector.broadcast %cst_14 : f32 to vector<8x128xf32>
    %36 = arith.addf %35, %34 : vector<8x128xf32>
    %37 = arith.divf %35, %36 : vector<8x128xf32>
    %38 = vector.extract_strided_slice %37 {offsets = [0, 0], sizes = [8, 32], strides = [1, 1]} : vector<8x128xf32> to vector<8x32xf32>
    %39 = vector.extract_strided_slice %37 {offsets = [0, 32], sizes = [8, 32], strides = [1, 1]} : vector<8x128xf32> to vector<8x32xf32>
    %40 = vector.extract_strided_slice %37 {offsets = [0, 64], sizes = [8, 32], strides = [1, 1]} : vector<8x128xf32> to vector<8x32xf32>
    %cst_15 = arith.constant 2.000000e+00 : f32
    %41 = vector.broadcast %cst_15 : f32 to vector<8x32xf32>
    %42 = arith.mulf %41, %40 : vector<8x32xf32>
    %cst_16 = arith.constant 1.000000e+00 : f32
    %43 = vector.broadcast %cst_16 : f32 to vector<8x32xf32>
    %44 = arith.subf %42, %43 : vector<8x32xf32>
    %45 = vector.extract_strided_slice %37 {offsets = [0, 96], sizes = [8, 32], strides = [1, 1]} : vector<8x128xf32> to vector<8x32xf32>
    %46 = arith.mulf %39, %27 : vector<8x32xf32>
    %47 = arith.mulf %38, %44 : vector<8x32xf32>
    %48 = arith.addf %46, %47 : vector<8x32xf32>
    %49 = math.tanh %48 : vector<8x32xf32>
    %50 = arith.mulf %45, %49 : vector<8x32xf32>
    %51 = vector.extract_strided_slice %5 {offsets = [16, 0], sizes = [8, 128], strides = [1, 1]} : vector<64x128xf32> to vector<8x128xf32>
    %cst_17 = arith.constant dense<0.000000e+00> : vector<8x128xf32>
    %52 = tpu.matmul %50, %6, %cst_17 {dimension_numbers = #tpu.dot_dimension_numbers<[1], [0], [0], [1], [0, 0, 1, 1], [], []>} : vector<8x32xf32>, vector<32x128xf32>, vector<8x128xf32> -> vector<8x128xf32>
    %53 = arith.addf %51, %52 : vector<8x128xf32>
    %54 = arith.negf %53 : vector<8x128xf32>
    %55 = math.exp %54 : vector<8x128xf32>
    %cst_18 = arith.constant 1.000000e+00 : f32
    %56 = vector.broadcast %cst_18 : f32 to vector<8x128xf32>
    %57 = arith.addf %56, %55 : vector<8x128xf32>
    %58 = arith.divf %56, %57 : vector<8x128xf32>
    %59 = vector.extract_strided_slice %58 {offsets = [0, 0], sizes = [8, 32], strides = [1, 1]} : vector<8x128xf32> to vector<8x32xf32>
    %60 = vector.extract_strided_slice %58 {offsets = [0, 32], sizes = [8, 32], strides = [1, 1]} : vector<8x128xf32> to vector<8x32xf32>
    %61 = vector.extract_strided_slice %58 {offsets = [0, 64], sizes = [8, 32], strides = [1, 1]} : vector<8x128xf32> to vector<8x32xf32>
    %cst_19 = arith.constant 2.000000e+00 : f32
    %62 = vector.broadcast %cst_19 : f32 to vector<8x32xf32>
    %63 = arith.mulf %62, %61 : vector<8x32xf32>
    %cst_20 = arith.constant 1.000000e+00 : f32
    %64 = vector.broadcast %cst_20 : f32 to vector<8x32xf32>
    %65 = arith.subf %63, %64 : vector<8x32xf32>
    %66 = vector.extract_strided_slice %58 {offsets = [0, 96], sizes = [8, 32], strides = [1, 1]} : vector<8x128xf32> to vector<8x32xf32>
    %67 = arith.mulf %60, %48 : vector<8x32xf32>
    %68 = arith.mulf %59, %65 : vector<8x32xf32>
    %69 = arith.addf %67, %68 : vector<8x32xf32>
    %70 = math.tanh %69 : vector<8x32xf32>
    %71 = arith.mulf %66, %70 : vector<8x32xf32>
    %72 = vector.extract_strided_slice %5 {offsets = [24, 0], sizes = [8, 128], strides = [1, 1]} : vector<64x128xf32> to vector<8x128xf32>
    %cst_21 = arith.constant dense<0.000000e+00> : vector<8x128xf32>
    %73 = tpu.matmul %71, %6, %cst_21 {dimension_numbers = #tpu.dot_dimension_numbers<[1], [0], [0], [1], [0, 0, 1, 1], [], []>} : vector<8x32xf32>, vector<32x128xf32>, vector<8x128xf32> -> vector<8x128xf32>
    %74 = arith.addf %72, %73 : vector<8x128xf32>
    %75 = arith.negf %74 : vector<8x128xf32>
    %76 = math.exp %75 : vector<8x128xf32>
    %cst_22 = arith.constant 1.000000e+00 : f32
    %77 = vector.broadcast %cst_22 : f32 to vector<8x128xf32>
    %78 = arith.addf %77, %76 : vector<8x128xf32>
    %79 = arith.divf %77, %78 : vector<8x128xf32>
    %80 = vector.extract_strided_slice %79 {offsets = [0, 0], sizes = [8, 32], strides = [1, 1]} : vector<8x128xf32> to vector<8x32xf32>
    %81 = vector.extract_strided_slice %79 {offsets = [0, 32], sizes = [8, 32], strides = [1, 1]} : vector<8x128xf32> to vector<8x32xf32>
    %82 = vector.extract_strided_slice %79 {offsets = [0, 64], sizes = [8, 32], strides = [1, 1]} : vector<8x128xf32> to vector<8x32xf32>
    %cst_23 = arith.constant 2.000000e+00 : f32
    %83 = vector.broadcast %cst_23 : f32 to vector<8x32xf32>
    %84 = arith.mulf %83, %82 : vector<8x32xf32>
    %cst_24 = arith.constant 1.000000e+00 : f32
    %85 = vector.broadcast %cst_24 : f32 to vector<8x32xf32>
    %86 = arith.subf %84, %85 : vector<8x32xf32>
    %87 = vector.extract_strided_slice %79 {offsets = [0, 96], sizes = [8, 32], strides = [1, 1]} : vector<8x128xf32> to vector<8x32xf32>
    %88 = arith.mulf %81, %69 : vector<8x32xf32>
    %89 = arith.mulf %80, %86 : vector<8x32xf32>
    %90 = arith.addf %88, %89 : vector<8x32xf32>
    %91 = math.tanh %90 : vector<8x32xf32>
    %92 = arith.mulf %87, %91 : vector<8x32xf32>
    %93 = vector.extract_strided_slice %5 {offsets = [32, 0], sizes = [8, 128], strides = [1, 1]} : vector<64x128xf32> to vector<8x128xf32>
    %cst_25 = arith.constant dense<0.000000e+00> : vector<8x128xf32>
    %94 = tpu.matmul %92, %6, %cst_25 {dimension_numbers = #tpu.dot_dimension_numbers<[1], [0], [0], [1], [0, 0, 1, 1], [], []>} : vector<8x32xf32>, vector<32x128xf32>, vector<8x128xf32> -> vector<8x128xf32>
    %95 = arith.addf %93, %94 : vector<8x128xf32>
    %96 = arith.negf %95 : vector<8x128xf32>
    %97 = math.exp %96 : vector<8x128xf32>
    %cst_26 = arith.constant 1.000000e+00 : f32
    %98 = vector.broadcast %cst_26 : f32 to vector<8x128xf32>
    %99 = arith.addf %98, %97 : vector<8x128xf32>
    %100 = arith.divf %98, %99 : vector<8x128xf32>
    %101 = vector.extract_strided_slice %100 {offsets = [0, 0], sizes = [8, 32], strides = [1, 1]} : vector<8x128xf32> to vector<8x32xf32>
    %102 = vector.extract_strided_slice %100 {offsets = [0, 32], sizes = [8, 32], strides = [1, 1]} : vector<8x128xf32> to vector<8x32xf32>
    %103 = vector.extract_strided_slice %100 {offsets = [0, 64], sizes = [8, 32], strides = [1, 1]} : vector<8x128xf32> to vector<8x32xf32>
    %cst_27 = arith.constant 2.000000e+00 : f32
    %104 = vector.broadcast %cst_27 : f32 to vector<8x32xf32>
    %105 = arith.mulf %104, %103 : vector<8x32xf32>
    %cst_28 = arith.constant 1.000000e+00 : f32
    %106 = vector.broadcast %cst_28 : f32 to vector<8x32xf32>
    %107 = arith.subf %105, %106 : vector<8x32xf32>
    %108 = vector.extract_strided_slice %100 {offsets = [0, 96], sizes = [8, 32], strides = [1, 1]} : vector<8x128xf32> to vector<8x32xf32>
    %109 = arith.mulf %102, %90 : vector<8x32xf32>
    %110 = arith.mulf %101, %107 : vector<8x32xf32>
    %111 = arith.addf %109, %110 : vector<8x32xf32>
    %112 = math.tanh %111 : vector<8x32xf32>
    %113 = arith.mulf %108, %112 : vector<8x32xf32>
    %114 = vector.extract_strided_slice %5 {offsets = [40, 0], sizes = [8, 128], strides = [1, 1]} : vector<64x128xf32> to vector<8x128xf32>
    %cst_29 = arith.constant dense<0.000000e+00> : vector<8x128xf32>
    %115 = tpu.matmul %113, %6, %cst_29 {dimension_numbers = #tpu.dot_dimension_numbers<[1], [0], [0], [1], [0, 0, 1, 1], [], []>} : vector<8x32xf32>, vector<32x128xf32>, vector<8x128xf32> -> vector<8x128xf32>
    %116 = arith.addf %114, %115 : vector<8x128xf32>
    %117 = arith.negf %116 : vector<8x128xf32>
    %118 = math.exp %117 : vector<8x128xf32>
    %cst_30 = arith.constant 1.000000e+00 : f32
    %119 = vector.broadcast %cst_30 : f32 to vector<8x128xf32>
    %120 = arith.addf %119, %118 : vector<8x128xf32>
    %121 = arith.divf %119, %120 : vector<8x128xf32>
    %122 = vector.extract_strided_slice %121 {offsets = [0, 0], sizes = [8, 32], strides = [1, 1]} : vector<8x128xf32> to vector<8x32xf32>
    %123 = vector.extract_strided_slice %121 {offsets = [0, 32], sizes = [8, 32], strides = [1, 1]} : vector<8x128xf32> to vector<8x32xf32>
    %124 = vector.extract_strided_slice %121 {offsets = [0, 64], sizes = [8, 32], strides = [1, 1]} : vector<8x128xf32> to vector<8x32xf32>
    %cst_31 = arith.constant 2.000000e+00 : f32
    %125 = vector.broadcast %cst_31 : f32 to vector<8x32xf32>
    %126 = arith.mulf %125, %124 : vector<8x32xf32>
    %cst_32 = arith.constant 1.000000e+00 : f32
    %127 = vector.broadcast %cst_32 : f32 to vector<8x32xf32>
    %128 = arith.subf %126, %127 : vector<8x32xf32>
    %129 = vector.extract_strided_slice %121 {offsets = [0, 96], sizes = [8, 32], strides = [1, 1]} : vector<8x128xf32> to vector<8x32xf32>
    %130 = arith.mulf %123, %111 : vector<8x32xf32>
    %131 = arith.mulf %122, %128 : vector<8x32xf32>
    %132 = arith.addf %130, %131 : vector<8x32xf32>
    %133 = math.tanh %132 : vector<8x32xf32>
    %134 = arith.mulf %129, %133 : vector<8x32xf32>
    %135 = vector.extract_strided_slice %5 {offsets = [48, 0], sizes = [8, 128], strides = [1, 1]} : vector<64x128xf32> to vector<8x128xf32>
    %cst_33 = arith.constant dense<0.000000e+00> : vector<8x128xf32>
    %136 = tpu.matmul %134, %6, %cst_33 {dimension_numbers = #tpu.dot_dimension_numbers<[1], [0], [0], [1], [0, 0, 1, 1], [], []>} : vector<8x32xf32>, vector<32x128xf32>, vector<8x128xf32> -> vector<8x128xf32>
    %137 = arith.addf %135, %136 : vector<8x128xf32>
    %138 = arith.negf %137 : vector<8x128xf32>
    %139 = math.exp %138 : vector<8x128xf32>
    %cst_34 = arith.constant 1.000000e+00 : f32
    %140 = vector.broadcast %cst_34 : f32 to vector<8x128xf32>
    %141 = arith.addf %140, %139 : vector<8x128xf32>
    %142 = arith.divf %140, %141 : vector<8x128xf32>
    %143 = vector.extract_strided_slice %142 {offsets = [0, 0], sizes = [8, 32], strides = [1, 1]} : vector<8x128xf32> to vector<8x32xf32>
    %144 = vector.extract_strided_slice %142 {offsets = [0, 32], sizes = [8, 32], strides = [1, 1]} : vector<8x128xf32> to vector<8x32xf32>
    %145 = vector.extract_strided_slice %142 {offsets = [0, 64], sizes = [8, 32], strides = [1, 1]} : vector<8x128xf32> to vector<8x32xf32>
    %cst_35 = arith.constant 2.000000e+00 : f32
    %146 = vector.broadcast %cst_35 : f32 to vector<8x32xf32>
    %147 = arith.mulf %146, %145 : vector<8x32xf32>
    %cst_36 = arith.constant 1.000000e+00 : f32
    %148 = vector.broadcast %cst_36 : f32 to vector<8x32xf32>
    %149 = arith.subf %147, %148 : vector<8x32xf32>
    %150 = vector.extract_strided_slice %142 {offsets = [0, 96], sizes = [8, 32], strides = [1, 1]} : vector<8x128xf32> to vector<8x32xf32>
    %151 = arith.mulf %144, %132 : vector<8x32xf32>
    %152 = arith.mulf %143, %149 : vector<8x32xf32>
    %153 = arith.addf %151, %152 : vector<8x32xf32>
    %154 = math.tanh %153 : vector<8x32xf32>
    %155 = arith.mulf %150, %154 : vector<8x32xf32>
    %156 = vector.extract_strided_slice %5 {offsets = [56, 0], sizes = [8, 128], strides = [1, 1]} : vector<64x128xf32> to vector<8x128xf32>
    %cst_37 = arith.constant dense<0.000000e+00> : vector<8x128xf32>
    %157 = tpu.matmul %155, %6, %cst_37 {dimension_numbers = #tpu.dot_dimension_numbers<[1], [0], [0], [1], [0, 0, 1, 1], [], []>} : vector<8x32xf32>, vector<32x128xf32>, vector<8x128xf32> -> vector<8x128xf32>
    %158 = arith.addf %156, %157 : vector<8x128xf32>
    %159 = arith.negf %158 : vector<8x128xf32>
    %160 = math.exp %159 : vector<8x128xf32>
    %cst_38 = arith.constant 1.000000e+00 : f32
    %161 = vector.broadcast %cst_38 : f32 to vector<8x128xf32>
    %162 = arith.addf %161, %160 : vector<8x128xf32>
    %163 = arith.divf %161, %162 : vector<8x128xf32>
    %164 = vector.extract_strided_slice %163 {offsets = [0, 0], sizes = [8, 32], strides = [1, 1]} : vector<8x128xf32> to vector<8x32xf32>
    %165 = vector.extract_strided_slice %163 {offsets = [0, 32], sizes = [8, 32], strides = [1, 1]} : vector<8x128xf32> to vector<8x32xf32>
    %166 = vector.extract_strided_slice %163 {offsets = [0, 64], sizes = [8, 32], strides = [1, 1]} : vector<8x128xf32> to vector<8x32xf32>
    %cst_39 = arith.constant 2.000000e+00 : f32
    %167 = vector.broadcast %cst_39 : f32 to vector<8x32xf32>
    %168 = arith.mulf %167, %166 : vector<8x32xf32>
    %cst_40 = arith.constant 1.000000e+00 : f32
    %169 = vector.broadcast %cst_40 : f32 to vector<8x32xf32>
    %170 = arith.subf %168, %169 : vector<8x32xf32>
    %171 = vector.extract_strided_slice %163 {offsets = [0, 96], sizes = [8, 32], strides = [1, 1]} : vector<8x128xf32> to vector<8x32xf32>
    %172 = arith.mulf %165, %153 : vector<8x32xf32>
    %173 = arith.mulf %164, %170 : vector<8x32xf32>
    %174 = arith.addf %172, %173 : vector<8x32xf32>
    %175 = math.tanh %174 : vector<8x32xf32>
    %176 = arith.mulf %171, %175 : vector<8x32xf32>
    %177 = tpu.concatenate %29, %50, %71, %92, %113, %134, %155, %176 in 0 : vector<8x32xf32>, vector<8x32xf32>, vector<8x32xf32>, vector<8x32xf32>, vector<8x32xf32>, vector<8x32xf32>, vector<8x32xf32>, vector<8x32xf32> -> vector<64x32xf32>
    %c0_41 = arith.constant 0 : index
    %c0_42 = arith.constant 0 : index
    %178 = vector.load %arg4[%c0_41, %c0_42] : memref<32x128xf32, #tpu.memory_space<vmem>>, vector<32x128xf32>
    %cst_43 = arith.constant dense<0.000000e+00> : vector<64x128xf32>
    %179 = tpu.matmul %177, %178, %cst_43 {dimension_numbers = #tpu.dot_dimension_numbers<[1], [0], [0], [1], [0, 0, 1, 1], [], []>} : vector<64x32xf32>, vector<32x128xf32>, vector<64x128xf32> -> vector<64x128xf32>
    %c0_44 = arith.constant 0 : index
    %c0_45 = arith.constant 0 : index
    %180 = vector.load %arg6[%c0_44, %c0_45] : memref<1x128xf32, #tpu.memory_space<vmem>>, vector<1x128xf32>
    %181 = vector.broadcast %180 : vector<1x128xf32> to vector<64x128xf32>
    %182 = arith.addf %179, %181 : vector<64x128xf32>
    %c0_46 = arith.constant 0 : index
    %c0_47 = arith.constant 0 : index
    %183 = vector.load %arg5[%c0_46, %c0_47] : memref<32x128xf32, #tpu.memory_space<vmem>>, vector<32x128xf32>
    %cst_48 = arith.constant 0.000000e+00 : f32
    %184 = vector.broadcast %cst_48 : f32 to vector<8x32xf32>
    %cst_49 = arith.constant 0.000000e+00 : f32
    %185 = vector.broadcast %cst_49 : f32 to vector<8x32xf32>
    %186 = vector.extract_strided_slice %182 {offsets = [0, 0], sizes = [8, 128], strides = [1, 1]} : vector<64x128xf32> to vector<8x128xf32>
    %cst_50 = arith.constant dense<0.000000e+00> : vector<8x128xf32>
    %187 = tpu.matmul %184, %183, %cst_50 {dimension_numbers = #tpu.dot_dimension_numbers<[1], [0], [0], [1], [0, 0, 1, 1], [], []>} : vector<8x32xf32>, vector<32x128xf32>, vector<8x128xf32> -> vector<8x128xf32>
    %188 = arith.addf %186, %187 : vector<8x128xf32>
    %189 = arith.negf %188 : vector<8x128xf32>
    %190 = math.exp %189 : vector<8x128xf32>
    %cst_51 = arith.constant 1.000000e+00 : f32
    %191 = vector.broadcast %cst_51 : f32 to vector<8x128xf32>
    %192 = arith.addf %191, %190 : vector<8x128xf32>
    %193 = arith.divf %191, %192 : vector<8x128xf32>
    %194 = vector.extract_strided_slice %193 {offsets = [0, 0], sizes = [8, 32], strides = [1, 1]} : vector<8x128xf32> to vector<8x32xf32>
    %195 = vector.extract_strided_slice %193 {offsets = [0, 32], sizes = [8, 32], strides = [1, 1]} : vector<8x128xf32> to vector<8x32xf32>
    %196 = vector.extract_strided_slice %193 {offsets = [0, 64], sizes = [8, 32], strides = [1, 1]} : vector<8x128xf32> to vector<8x32xf32>
    %cst_52 = arith.constant 2.000000e+00 : f32
    %197 = vector.broadcast %cst_52 : f32 to vector<8x32xf32>
    %198 = arith.mulf %197, %196 : vector<8x32xf32>
    %cst_53 = arith.constant 1.000000e+00 : f32
    %199 = vector.broadcast %cst_53 : f32 to vector<8x32xf32>
    %200 = arith.subf %198, %199 : vector<8x32xf32>
    %201 = vector.extract_strided_slice %193 {offsets = [0, 96], sizes = [8, 32], strides = [1, 1]} : vector<8x128xf32> to vector<8x32xf32>
    %202 = arith.mulf %195, %185 : vector<8x32xf32>
    %203 = arith.mulf %194, %200 : vector<8x32xf32>
    %204 = arith.addf %202, %203 : vector<8x32xf32>
    %205 = math.tanh %204 : vector<8x32xf32>
    %206 = arith.mulf %201, %205 : vector<8x32xf32>
    %207 = vector.extract_strided_slice %182 {offsets = [8, 0], sizes = [8, 128], strides = [1, 1]} : vector<64x128xf32> to vector<8x128xf32>
    %cst_54 = arith.constant dense<0.000000e+00> : vector<8x128xf32>
    %208 = tpu.matmul %206, %183, %cst_54 {dimension_numbers = #tpu.dot_dimension_numbers<[1], [0], [0], [1], [0, 0, 1, 1], [], []>} : vector<8x32xf32>, vector<32x128xf32>, vector<8x128xf32> -> vector<8x128xf32>
    %209 = arith.addf %207, %208 : vector<8x128xf32>
    %210 = arith.negf %209 : vector<8x128xf32>
    %211 = math.exp %210 : vector<8x128xf32>
    %cst_55 = arith.constant 1.000000e+00 : f32
    %212 = vector.broadcast %cst_55 : f32 to vector<8x128xf32>
    %213 = arith.addf %212, %211 : vector<8x128xf32>
    %214 = arith.divf %212, %213 : vector<8x128xf32>
    %215 = vector.extract_strided_slice %214 {offsets = [0, 0], sizes = [8, 32], strides = [1, 1]} : vector<8x128xf32> to vector<8x32xf32>
    %216 = vector.extract_strided_slice %214 {offsets = [0, 32], sizes = [8, 32], strides = [1, 1]} : vector<8x128xf32> to vector<8x32xf32>
    %217 = vector.extract_strided_slice %214 {offsets = [0, 64], sizes = [8, 32], strides = [1, 1]} : vector<8x128xf32> to vector<8x32xf32>
    %cst_56 = arith.constant 2.000000e+00 : f32
    %218 = vector.broadcast %cst_56 : f32 to vector<8x32xf32>
    %219 = arith.mulf %218, %217 : vector<8x32xf32>
    %cst_57 = arith.constant 1.000000e+00 : f32
    %220 = vector.broadcast %cst_57 : f32 to vector<8x32xf32>
    %221 = arith.subf %219, %220 : vector<8x32xf32>
    %222 = vector.extract_strided_slice %214 {offsets = [0, 96], sizes = [8, 32], strides = [1, 1]} : vector<8x128xf32> to vector<8x32xf32>
    %223 = arith.mulf %216, %204 : vector<8x32xf32>
    %224 = arith.mulf %215, %221 : vector<8x32xf32>
    %225 = arith.addf %223, %224 : vector<8x32xf32>
    %226 = math.tanh %225 : vector<8x32xf32>
    %227 = arith.mulf %222, %226 : vector<8x32xf32>
    %228 = vector.extract_strided_slice %182 {offsets = [16, 0], sizes = [8, 128], strides = [1, 1]} : vector<64x128xf32> to vector<8x128xf32>
    %cst_58 = arith.constant dense<0.000000e+00> : vector<8x128xf32>
    %229 = tpu.matmul %227, %183, %cst_58 {dimension_numbers = #tpu.dot_dimension_numbers<[1], [0], [0], [1], [0, 0, 1, 1], [], []>} : vector<8x32xf32>, vector<32x128xf32>, vector<8x128xf32> -> vector<8x128xf32>
    %230 = arith.addf %228, %229 : vector<8x128xf32>
    %231 = arith.negf %230 : vector<8x128xf32>
    %232 = math.exp %231 : vector<8x128xf32>
    %cst_59 = arith.constant 1.000000e+00 : f32
    %233 = vector.broadcast %cst_59 : f32 to vector<8x128xf32>
    %234 = arith.addf %233, %232 : vector<8x128xf32>
    %235 = arith.divf %233, %234 : vector<8x128xf32>
    %236 = vector.extract_strided_slice %235 {offsets = [0, 0], sizes = [8, 32], strides = [1, 1]} : vector<8x128xf32> to vector<8x32xf32>
    %237 = vector.extract_strided_slice %235 {offsets = [0, 32], sizes = [8, 32], strides = [1, 1]} : vector<8x128xf32> to vector<8x32xf32>
    %238 = vector.extract_strided_slice %235 {offsets = [0, 64], sizes = [8, 32], strides = [1, 1]} : vector<8x128xf32> to vector<8x32xf32>
    %cst_60 = arith.constant 2.000000e+00 : f32
    %239 = vector.broadcast %cst_60 : f32 to vector<8x32xf32>
    %240 = arith.mulf %239, %238 : vector<8x32xf32>
    %cst_61 = arith.constant 1.000000e+00 : f32
    %241 = vector.broadcast %cst_61 : f32 to vector<8x32xf32>
    %242 = arith.subf %240, %241 : vector<8x32xf32>
    %243 = vector.extract_strided_slice %235 {offsets = [0, 96], sizes = [8, 32], strides = [1, 1]} : vector<8x128xf32> to vector<8x32xf32>
    %244 = arith.mulf %237, %225 : vector<8x32xf32>
    %245 = arith.mulf %236, %242 : vector<8x32xf32>
    %246 = arith.addf %244, %245 : vector<8x32xf32>
    %247 = math.tanh %246 : vector<8x32xf32>
    %248 = arith.mulf %243, %247 : vector<8x32xf32>
    %249 = vector.extract_strided_slice %182 {offsets = [24, 0], sizes = [8, 128], strides = [1, 1]} : vector<64x128xf32> to vector<8x128xf32>
    %cst_62 = arith.constant dense<0.000000e+00> : vector<8x128xf32>
    %250 = tpu.matmul %248, %183, %cst_62 {dimension_numbers = #tpu.dot_dimension_numbers<[1], [0], [0], [1], [0, 0, 1, 1], [], []>} : vector<8x32xf32>, vector<32x128xf32>, vector<8x128xf32> -> vector<8x128xf32>
    %251 = arith.addf %249, %250 : vector<8x128xf32>
    %252 = arith.negf %251 : vector<8x128xf32>
    %253 = math.exp %252 : vector<8x128xf32>
    %cst_63 = arith.constant 1.000000e+00 : f32
    %254 = vector.broadcast %cst_63 : f32 to vector<8x128xf32>
    %255 = arith.addf %254, %253 : vector<8x128xf32>
    %256 = arith.divf %254, %255 : vector<8x128xf32>
    %257 = vector.extract_strided_slice %256 {offsets = [0, 0], sizes = [8, 32], strides = [1, 1]} : vector<8x128xf32> to vector<8x32xf32>
    %258 = vector.extract_strided_slice %256 {offsets = [0, 32], sizes = [8, 32], strides = [1, 1]} : vector<8x128xf32> to vector<8x32xf32>
    %259 = vector.extract_strided_slice %256 {offsets = [0, 64], sizes = [8, 32], strides = [1, 1]} : vector<8x128xf32> to vector<8x32xf32>
    %cst_64 = arith.constant 2.000000e+00 : f32
    %260 = vector.broadcast %cst_64 : f32 to vector<8x32xf32>
    %261 = arith.mulf %260, %259 : vector<8x32xf32>
    %cst_65 = arith.constant 1.000000e+00 : f32
    %262 = vector.broadcast %cst_65 : f32 to vector<8x32xf32>
    %263 = arith.subf %261, %262 : vector<8x32xf32>
    %264 = vector.extract_strided_slice %256 {offsets = [0, 96], sizes = [8, 32], strides = [1, 1]} : vector<8x128xf32> to vector<8x32xf32>
    %265 = arith.mulf %258, %246 : vector<8x32xf32>
    %266 = arith.mulf %257, %263 : vector<8x32xf32>
    %267 = arith.addf %265, %266 : vector<8x32xf32>
    %268 = math.tanh %267 : vector<8x32xf32>
    %269 = arith.mulf %264, %268 : vector<8x32xf32>
    %270 = vector.extract_strided_slice %182 {offsets = [32, 0], sizes = [8, 128], strides = [1, 1]} : vector<64x128xf32> to vector<8x128xf32>
    %cst_66 = arith.constant dense<0.000000e+00> : vector<8x128xf32>
    %271 = tpu.matmul %269, %183, %cst_66 {dimension_numbers = #tpu.dot_dimension_numbers<[1], [0], [0], [1], [0, 0, 1, 1], [], []>} : vector<8x32xf32>, vector<32x128xf32>, vector<8x128xf32> -> vector<8x128xf32>
    %272 = arith.addf %270, %271 : vector<8x128xf32>
    %273 = arith.negf %272 : vector<8x128xf32>
    %274 = math.exp %273 : vector<8x128xf32>
    %cst_67 = arith.constant 1.000000e+00 : f32
    %275 = vector.broadcast %cst_67 : f32 to vector<8x128xf32>
    %276 = arith.addf %275, %274 : vector<8x128xf32>
    %277 = arith.divf %275, %276 : vector<8x128xf32>
    %278 = vector.extract_strided_slice %277 {offsets = [0, 0], sizes = [8, 32], strides = [1, 1]} : vector<8x128xf32> to vector<8x32xf32>
    %279 = vector.extract_strided_slice %277 {offsets = [0, 32], sizes = [8, 32], strides = [1, 1]} : vector<8x128xf32> to vector<8x32xf32>
    %280 = vector.extract_strided_slice %277 {offsets = [0, 64], sizes = [8, 32], strides = [1, 1]} : vector<8x128xf32> to vector<8x32xf32>
    %cst_68 = arith.constant 2.000000e+00 : f32
    %281 = vector.broadcast %cst_68 : f32 to vector<8x32xf32>
    %282 = arith.mulf %281, %280 : vector<8x32xf32>
    %cst_69 = arith.constant 1.000000e+00 : f32
    %283 = vector.broadcast %cst_69 : f32 to vector<8x32xf32>
    %284 = arith.subf %282, %283 : vector<8x32xf32>
    %285 = vector.extract_strided_slice %277 {offsets = [0, 96], sizes = [8, 32], strides = [1, 1]} : vector<8x128xf32> to vector<8x32xf32>
    %286 = arith.mulf %279, %267 : vector<8x32xf32>
    %287 = arith.mulf %278, %284 : vector<8x32xf32>
    %288 = arith.addf %286, %287 : vector<8x32xf32>
    %289 = math.tanh %288 : vector<8x32xf32>
    %290 = arith.mulf %285, %289 : vector<8x32xf32>
    %291 = vector.extract_strided_slice %182 {offsets = [40, 0], sizes = [8, 128], strides = [1, 1]} : vector<64x128xf32> to vector<8x128xf32>
    %cst_70 = arith.constant dense<0.000000e+00> : vector<8x128xf32>
    %292 = tpu.matmul %290, %183, %cst_70 {dimension_numbers = #tpu.dot_dimension_numbers<[1], [0], [0], [1], [0, 0, 1, 1], [], []>} : vector<8x32xf32>, vector<32x128xf32>, vector<8x128xf32> -> vector<8x128xf32>
    %293 = arith.addf %291, %292 : vector<8x128xf32>
    %294 = arith.negf %293 : vector<8x128xf32>
    %295 = math.exp %294 : vector<8x128xf32>
    %cst_71 = arith.constant 1.000000e+00 : f32
    %296 = vector.broadcast %cst_71 : f32 to vector<8x128xf32>
    %297 = arith.addf %296, %295 : vector<8x128xf32>
    %298 = arith.divf %296, %297 : vector<8x128xf32>
    %299 = vector.extract_strided_slice %298 {offsets = [0, 0], sizes = [8, 32], strides = [1, 1]} : vector<8x128xf32> to vector<8x32xf32>
    %300 = vector.extract_strided_slice %298 {offsets = [0, 32], sizes = [8, 32], strides = [1, 1]} : vector<8x128xf32> to vector<8x32xf32>
    %301 = vector.extract_strided_slice %298 {offsets = [0, 64], sizes = [8, 32], strides = [1, 1]} : vector<8x128xf32> to vector<8x32xf32>
    %cst_72 = arith.constant 2.000000e+00 : f32
    %302 = vector.broadcast %cst_72 : f32 to vector<8x32xf32>
    %303 = arith.mulf %302, %301 : vector<8x32xf32>
    %cst_73 = arith.constant 1.000000e+00 : f32
    %304 = vector.broadcast %cst_73 : f32 to vector<8x32xf32>
    %305 = arith.subf %303, %304 : vector<8x32xf32>
    %306 = vector.extract_strided_slice %298 {offsets = [0, 96], sizes = [8, 32], strides = [1, 1]} : vector<8x128xf32> to vector<8x32xf32>
    %307 = arith.mulf %300, %288 : vector<8x32xf32>
    %308 = arith.mulf %299, %305 : vector<8x32xf32>
    %309 = arith.addf %307, %308 : vector<8x32xf32>
    %310 = math.tanh %309 : vector<8x32xf32>
    %311 = arith.mulf %306, %310 : vector<8x32xf32>
    %312 = vector.extract_strided_slice %182 {offsets = [48, 0], sizes = [8, 128], strides = [1, 1]} : vector<64x128xf32> to vector<8x128xf32>
    %cst_74 = arith.constant dense<0.000000e+00> : vector<8x128xf32>
    %313 = tpu.matmul %311, %183, %cst_74 {dimension_numbers = #tpu.dot_dimension_numbers<[1], [0], [0], [1], [0, 0, 1, 1], [], []>} : vector<8x32xf32>, vector<32x128xf32>, vector<8x128xf32> -> vector<8x128xf32>
    %314 = arith.addf %312, %313 : vector<8x128xf32>
    %315 = arith.negf %314 : vector<8x128xf32>
    %316 = math.exp %315 : vector<8x128xf32>
    %cst_75 = arith.constant 1.000000e+00 : f32
    %317 = vector.broadcast %cst_75 : f32 to vector<8x128xf32>
    %318 = arith.addf %317, %316 : vector<8x128xf32>
    %319 = arith.divf %317, %318 : vector<8x128xf32>
    %320 = vector.extract_strided_slice %319 {offsets = [0, 0], sizes = [8, 32], strides = [1, 1]} : vector<8x128xf32> to vector<8x32xf32>
    %321 = vector.extract_strided_slice %319 {offsets = [0, 32], sizes = [8, 32], strides = [1, 1]} : vector<8x128xf32> to vector<8x32xf32>
    %322 = vector.extract_strided_slice %319 {offsets = [0, 64], sizes = [8, 32], strides = [1, 1]} : vector<8x128xf32> to vector<8x32xf32>
    %cst_76 = arith.constant 2.000000e+00 : f32
    %323 = vector.broadcast %cst_76 : f32 to vector<8x32xf32>
    %324 = arith.mulf %323, %322 : vector<8x32xf32>
    %cst_77 = arith.constant 1.000000e+00 : f32
    %325 = vector.broadcast %cst_77 : f32 to vector<8x32xf32>
    %326 = arith.subf %324, %325 : vector<8x32xf32>
    %327 = vector.extract_strided_slice %319 {offsets = [0, 96], sizes = [8, 32], strides = [1, 1]} : vector<8x128xf32> to vector<8x32xf32>
    %328 = arith.mulf %321, %309 : vector<8x32xf32>
    %329 = arith.mulf %320, %326 : vector<8x32xf32>
    %330 = arith.addf %328, %329 : vector<8x32xf32>
    %331 = math.tanh %330 : vector<8x32xf32>
    %332 = arith.mulf %327, %331 : vector<8x32xf32>
    %333 = vector.extract_strided_slice %182 {offsets = [56, 0], sizes = [8, 128], strides = [1, 1]} : vector<64x128xf32> to vector<8x128xf32>
    %cst_78 = arith.constant dense<0.000000e+00> : vector<8x128xf32>
    %334 = tpu.matmul %332, %183, %cst_78 {dimension_numbers = #tpu.dot_dimension_numbers<[1], [0], [0], [1], [0, 0, 1, 1], [], []>} : vector<8x32xf32>, vector<32x128xf32>, vector<8x128xf32> -> vector<8x128xf32>
    %335 = arith.addf %333, %334 : vector<8x128xf32>
    %336 = arith.negf %335 : vector<8x128xf32>
    %337 = math.exp %336 : vector<8x128xf32>
    %cst_79 = arith.constant 1.000000e+00 : f32
    %338 = vector.broadcast %cst_79 : f32 to vector<8x128xf32>
    %339 = arith.addf %338, %337 : vector<8x128xf32>
    %340 = arith.divf %338, %339 : vector<8x128xf32>
    %341 = vector.extract_strided_slice %340 {offsets = [0, 0], sizes = [8, 32], strides = [1, 1]} : vector<8x128xf32> to vector<8x32xf32>
    %342 = vector.extract_strided_slice %340 {offsets = [0, 32], sizes = [8, 32], strides = [1, 1]} : vector<8x128xf32> to vector<8x32xf32>
    %343 = vector.extract_strided_slice %340 {offsets = [0, 64], sizes = [8, 32], strides = [1, 1]} : vector<8x128xf32> to vector<8x32xf32>
    %cst_80 = arith.constant 2.000000e+00 : f32
    %344 = vector.broadcast %cst_80 : f32 to vector<8x32xf32>
    %345 = arith.mulf %344, %343 : vector<8x32xf32>
    %cst_81 = arith.constant 1.000000e+00 : f32
    %346 = vector.broadcast %cst_81 : f32 to vector<8x32xf32>
    %347 = arith.subf %345, %346 : vector<8x32xf32>
    %348 = vector.extract_strided_slice %340 {offsets = [0, 96], sizes = [8, 32], strides = [1, 1]} : vector<8x128xf32> to vector<8x32xf32>
    %349 = arith.mulf %342, %330 : vector<8x32xf32>
    %350 = arith.mulf %341, %347 : vector<8x32xf32>
    %351 = arith.addf %349, %350 : vector<8x32xf32>
    %352 = math.tanh %351 : vector<8x32xf32>
    %353 = arith.mulf %348, %352 : vector<8x32xf32>
    %c0_82 = arith.constant 0 : index
    %c0_83 = arith.constant 0 : index
    %354 = vector.load %arg7[%c0_82, %c0_83] : memref<1x32xf32, #tpu.memory_space<vmem>>, vector<1x32xf32>
    %355 = vector.broadcast %354 : vector<1x32xf32> to vector<8x32xf32>
    %356 = arith.mulf %353, %355 : vector<8x32xf32>
    %cst_84 = arith.constant dense<0.000000e+00> : vector<8xf32>
    %357 = vector.multi_reduction <add>, %356, %cst_84 [1] : vector<8x32xf32> to vector<8xf32>
    %358 = vector.shape_cast %357 : vector<8xf32> to vector<8x1xf32>
    %c0_85 = arith.constant 0 : index
    %c0_86 = arith.constant 0 : index
    %359 = vector.load %arg8[%c0_85, %c0_86] : memref<1x1xf32, #tpu.memory_space<vmem>>, vector<1x1xf32>
    %360 = vector.broadcast %359 : vector<1x1xf32> to vector<8x1xf32>
    %361 = arith.addf %358, %360 : vector<8x1xf32>
    %c0_87 = arith.constant 0 : index
    %c0_88 = arith.constant 0 : index
    %362 = vector.load %arg9[%c0_87, %c0_88] : memref<8x1xf32, #tpu.memory_space<vmem>>, vector<8x1xf32>
    tpu.vector_store %arg9[%c0_87, %c0_88], %361 {strides = array<i32>} : memref<8x1xf32, #tpu.memory_space<vmem>>, vector<8x1xf32>,
    return
  }
}

</mosaic_0001>

<bundles_post_ra>
// kernel: lstm_model_forward.1
= control target key start
LH: loop header
LB: loop body
LE: loop exit
PB: predicated region body
PF: predicated region fallthrough
CT: control target
= control target key end

     0   :  { %vm48_vm0 = vcmask 130048   ;;  %v1386_v7 = vmov 0.0   ;;  %s1387_s23 = smov 64   ;;  %s1388_s24 = smov 32   ;;  %vm118_vm5 = vcmask 261120   ;;  %s1735_s2 = inlined_call_operand.vmem [shape: f32[32,128], index: 2, kind: input, shape index: {}]   ;;  %s1736_s1 = inlined_call_operand.vmem [shape: f32[16,128], index: 1, kind: input, shape index: {}]   ;;  %s1737_s0 = inlined_call_operand.vmem [shape: f32[64,16], index: 0, kind: input, shape index: {}]   ;;  %s1738_s3 = inlined_call_operand.vmem [shape: f32[1,128], index: 3, kind: input, shape index: {}]   ;;  %s1739_s4 = inlined_call_operand.vmem [shape: f32[32,128], index: 4, kind: input, shape index: {}]   ;;  %s1740_s6 = inlined_call_operand.vmem [shape: f32[1,128], index: 6, kind: input, shape index: {}]   ;;  %s1741_s5 = inlined_call_operand.vmem [shape: f32[32,128], index: 5, kind: input, shape index: {}]   ;;  %s1742_s7 = inlined_call_operand.vmem [shape: f32[1,32], index: 7, kind: input, shape index: {}]   ;;  %s1743_s8 = inlined_call_operand.<no memory space> [shape: f32[1,1], index: 8, kind: input, shape index: {}]   ;;  %s1744_s9 = inlined_call_operand.vmem [shape: f32[8,1], index: 9, kind: output, shape index: {}]  }
   0x1   :  { %v1443_v0 = vld [vmem:[%s1735_s2 + $0x18] sm:$0xff]  ;;  %v43_v1 = vld [vmem:[%s1736_s1 + $0x8] sm:$0xff]  ;;  %v1451_v2 = vld [vmem:[%s1735_s2 + $0x10] sm:$0xff] }
   0x2   :  { %134 = vmatpush.msra.mxu1 %v1443_v0  ;;  %87 = vmatpush.msra.mxu0 %v43_v1  ;;  %v42_v3 = vld [vmem:[%s1736_s1] sm:$0xff]  ;;  %v1463_v5 = vld [vmem:[%s1735_s2 + $0x8] sm:$0xff]  ;;  %v632_v34 = vld [vmem:[%s1739_s4 + $0x18] sm:$0xff] }
   0x3   :  { %v34_v4 = vld [vmem:[%s1737_s0] sm:$0xff]  ;;  %198 = vmatpush.msra.mxu2 %v1443_v0  ;;  %v631_v35 = vld [vmem:[%s1739_s4 + $0x10] sm:$0xff]  ;;  %654 = vmatpush.msra.mxu3 %v632_v34  ;;  %v630_v36 = vld [vmem:[%s1739_s4 + $0x8] sm:$0xff] }
   0x4   :  { %135 = vmatpush.msra.mxu1 %v1451_v2  ;;  %88 = vmatpush.msra.mxu0 %v42_v3  ;;  %v1471_v6 = vld [vmem:[%s1735_s2] sm:$0xff]  ;;  %v35_v40 = vld [vmem:[%s1737_s0 + $0x8] sm:$0xff] }
   0x5   :  { %1219 = vmatmul.msk.f32.vlgmr.msra.gmra.mxu0 %vm48_vm0, %v34_v4  ;;  %199 = vmatpush.msra.mxu2 %v1451_v2  ;;  %v1494_v8 = vld [vmem:[%s1738_s3] ss:$0 sm:$0xff] }
   0x6   :  { %136 = vmatpush.msra.mxu1 %v1463_v5  ;;  %655 = vmatpush.msra.mxu3 %v631_v35  ;;  %v629_v37 = vld [vmem:[%s1739_s4] sm:$0xff]  ;;  %s1389_s4 = smov 96  }
   0x7   :  { %200 = vmatpush.msra.mxu2 %v1463_v5 }
   0x8   :  { %137 = vmatpush.msra.mxu1 %v1471_v6  ;;  %656 = vmatpush.msra.mxu3 %v630_v36 }
   0x9   :  { %138 = vmatmul.f32.vlgmr.msra.gmra.mxu1 %v1386_v7  ;;  %201 = vmatpush.msra.mxu2 %v1471_v6 }
   0xa   :  { %262 = vmatpush.msrb.mxu1 %v1443_v0  ;;  %657 = vmatpush.msra.mxu3 %v629_v37 }
   0xb   :  { %390 = vmatpush.msrb.mxu2 %v1443_v0 }
   0xc   :  { %263 = vmatpush.msrb.mxu1 %v1451_v2 }
   0xd   :  { %391 = vmatpush.msrb.mxu2 %v1451_v2  ;;  %1220 = vmatmul.msk.f32.gmra.mxu0 %vm48_vm0, %v35_v40 }
   0xe   :  { %264 = vmatpush.msrb.mxu1 %v1463_v5 }
   0xf   :  { %392 = vmatpush.msrb.mxu2 %v1463_v5 }
  0x10   :  { %265 = vmatpush.msrb.mxu1 %v1471_v6 }
  0x11   :  { %393 = vmatpush.msrb.mxu2 %v1471_v6 }
  0x12   :  { %326 = vmatpush.msra.mxu1 %v1443_v0 }
  0x14   :  { %327 = vmatpush.msra.mxu1 %v1451_v2 }
  0x16   :  { %328 = vmatpush.msra.mxu1 %v1463_v5 }
  0x18   :  { %329 = vmatpush.msra.mxu1 %v1471_v6 }
  0x82   :  { %v90_v9 = vpop.f32.mrf.mxu0 }
  0x83   :  { %v91_v10 = vadd.f32 %v1494_v8, %v90_v9  ;;  %v36_v9 = vld [vmem:[%s1737_s0 + $0x10] sm:$0xff] }
  0x84   :  { %1221 = vmatmul.msk.f32.gmra.mxu0 %vm48_vm0, %v36_v9 }
  0x86   :  { %v139_v11 = vpop.f32.mrf.mxu1 }
  0x87   :  { %v142_v12 = vadd.f32 %v139_v11, %v91_v10 }
  0x89   :  { %v1227_v13 = vmul.f32 -1.442695, %v142_v12 }
  0x8a   :  { %v93_v42 = vpop.f32.mrf.mxu0 }
  0x8b   :  { %1289 = vpow2.f32 %v1227_v13  ;;  %v94_v43 = vadd.f32 %v1494_v8, %v93_v42 }
  0x91   :  { %v1290_v14 = vpop.eup %1289 }
  0x92   :  { %v146_v15 = vadd.f32 1.0, %v1290_v14 }
  0x94   :  { %1291 = vrcp.f32 %v146_v15  ;;  %v158_v19 = vand.u32 2147483648, %v146_v15  ;;  %v156_v21 = vand.u32 2147483647, %v146_v15  ;;  %vm152_vm2 = vweird.f32 %v146_v15 }
  0x96   :  { %v159_v23 = vor.u32 1.1754944e-38, %v158_v19  ;;  %vm157_vm4 = vcmp.eq.f32.partialorder %v156_v21, 8.507059e+37 }
  0x9a   :  { %v1292_v16 = vpop.eup %1291 }
  0x9b   :  { %v148_v17 = vmul.f32 %v1292_v16, %v146_v15  ;;  %vm153_vm1 = vweird.f32 %v1292_v16 }
  0x9c   :  { %vm154_vm3 = vmor %vm152_vm2, %vm153_vm1 }
  0x9d   :  { %v149_v18 = vsub.f32 1.0, %v148_v17 }
  0x9f   :  { %v150_v20 = vmul.f32 %v1292_v16, %v149_v18 }
  0xa1   :  { %v151_v22 = vadd.f32 %v1292_v16, %v150_v20 }
  0xa3   :  { %v155_v24 = vsel %vm154_vm3, %v1292_v16, %v151_v22 }
  0xa4   :  { %v160_v25 = vsel %vm157_vm4, %v159_v23, %v155_v24 }
  0xa5   :  { %v162_v26 = vmul.f32 2.0, %v160_v25  ;;  %v164_v30 = vmul.f32 0.0, %v160_v25 }
  0xa7   :  { %v1228_v27 = vadd.f32 -1.0, %v162_v26 }
  0xa9   :  { %166 = vrot.lane.b32.xlu0 %v1228_v27, %s1387_s23 }
 0x101   :  { %v96_v13 = vpop.f32.mrf.mxu0 }
 0x102   :  { %v97_v14 = vadd.f32 %v1494_v8, %v96_v13 }
 0x11b   :  { %v167_v28 = vpop.permute.xlu0 %166 }
 0x11c   :  { %v169_v29 = vmul.f32 %v167_v28, %v160_v25 }
 0x11e   :  { %171 = vrot.lane.b32.xlu0 %v169_v29, %s1388_s24 }
 0x190   :  { %v172_v31 = vpop.permute.xlu0 %171 }
 0x191   :  { %v174_v32 = vadd.f32 %v172_v31, %v164_v30 }
 0x193   :  { %1293 = vtanh.f32 %v174_v32 }
 0x199   :  { %v1294_v33 = vpop.eup %1293 }
 0x19a   :  { %177 = vrot.lane.b32.xlu1 %v1294_v33, %s1387_s23 }
 0x20c   :  { %v178_v38 = vpop.permute.xlu1 %177 }
 0x20d   :  { %v180_v39 = vmul.f32 %v178_v38, %v160_v25  ;;  %v37_v38 = vld [vmem:[%s1737_s0 + $0x18] sm:$0xff] }
 0x20e   :  { %1222 = vmatmul.msk.f32.gmra.mxu0 %vm48_vm0, %v37_v38 }
 0x20f   :  { %182 = vrot.lane.b32.xlu1 %v180_v39, %s1388_s24 }
 0x281   :  { %v183_v41 = vpop.permute.xlu1 %182 }
 0x282   :  { %1229 = vmatmul.msk.f32.vlgmr.msra.gmra.mxu2 %vm118_vm5, %v183_v41  ;;  %1250 = vmatmul.msk.f32.vlgmr.msra.gmra.mxu3 %vm118_vm5, %v183_v41 }
 0x283   :  { %454 = vmatpush.msra.mxu2 %v1443_v0 }
 0x285   :  { %455 = vmatpush.msra.mxu2 %v1451_v2 }
 0x287   :  { %456 = vmatpush.msra.mxu2 %v1463_v5 }
 0x289   :  { %457 = vmatpush.msra.mxu2 %v1471_v6 }
 0x28b   :  { %v99_v42 = vpop.f32.mrf.mxu0 }
 0x305   :  { %v203_v44 = vpop.f32.mrf.mxu2 }
 0x306   :  { %v206_v45 = vadd.f32 %v203_v44, %v94_v43  ;;  %v100_v43 = vadd.f32 %v1494_v8, %v99_v42 }
 0x308   :  { %v1230_v46 = vmul.f32 -1.442695, %v206_v45 }
 0x30a   :  { %1295 = vpow2.f32 %v1230_v46 }
 0x310   :  { %v1296_v47 = vpop.eup %1295 }
 0x311   :  { %v210_v48 = vadd.f32 1.0, %v1296_v47 }
 0x313   :  { %1297 = vrcp.f32 %v210_v48  ;;  %v222_v52 = vand.u32 2147483648, %v210_v48  ;;  %v220_v54 = vand.u32 2147483647, %v210_v48  ;;  %vm216_vm7 = vweird.f32 %v210_v48 }
 0x315   :  { %v223_v56 = vor.u32 1.1754944e-38, %v222_v52  ;;  %vm221_vm9 = vcmp.eq.f32.partialorder %v220_v54, 8.507059e+37 }
 0x319   :  { %v1298_v49 = vpop.eup %1297 }
 0x31a   :  { %v212_v50 = vmul.f32 %v1298_v49, %v210_v48  ;;  %vm217_vm6 = vweird.f32 %v1298_v49 }
 0x31b   :  { %vm218_vm8 = vmor %vm216_vm7, %vm217_vm6 }
 0x31c   :  { %v213_v51 = vsub.f32 1.0, %v212_v50 }
 0x31e   :  { %v214_v53 = vmul.f32 %v1298_v49, %v213_v51 }
 0x320   :  { %v215_v55 = vadd.f32 %v1298_v49, %v214_v53 }
 0x322   :  { %v219_v57 = vsel %vm218_vm8, %v1298_v49, %v215_v55 }
 0x323   :  { %v224_v58 = vsel %vm221_vm9, %v223_v56, %v219_v57 }
 0x324   :  { %v226_v59 = vmul.f32 2.0, %v224_v58  ;;  %v228_v63 = vmul.f32 %v224_v58, %v174_v32 }
 0x326   :  { %v1231_v60 = vadd.f32 -1.0, %v226_v59 }
 0x328   :  { %230 = vrot.lane.b32.xlu2 %v1231_v60, %s1387_s23 }
 0x382   :  { %v231_v61 = vpop.permute.xlu2 %230 }
 0x383   :  { %v233_v62 = vmul.f32 %v231_v61, %v224_v58 }
 0x385   :  { %235 = vrot.lane.b32.xlu2 %v233_v62, %s1388_s24 }
 0x3df   :  { %v236_v1 = vpop.permute.xlu2 %235 }
 0x3e0   :  { %v238_v3 = vadd.f32 %v236_v1, %v228_v63 }
 0x3e2   :  { %1299 = vtanh.f32 %v238_v3 }
 0x3e8   :  { %v1300_v4 = vpop.eup %1299 }
 0x3e9   :  { %241 = vrot.lane.b32.xlu0 %v1300_v4, %s1387_s23 }
 0x45b   :  { %v242_v10 = vpop.permute.xlu0 %241 }
 0x45c   :  { %v244_v11 = vmul.f32 %v242_v10, %v224_v58 }
 0x45e   :  { %246 = vrot.lane.b32.xlu1 %v244_v11, %s1388_s24  ;;  %v38_v11 = vld [vmem:[%s1737_s0 + $0x20] sm:$0xff] }
 0x45f   :  { %1223 = vmatmul.msk.f32.gmra.mxu0 %vm48_vm0, %v38_v11  ;;  %v1609_v11 = vld [vmem:[%s1741_s5] sm:$0xff] }
 0x4d0   :  { %v247_v12 = vpop.permute.xlu1 %246 }
 0x4d1   :  { %1232 = vmatmul.msk.f32.vlgmr.msrb.gmra.mxu1 %vm118_vm5, %v247_v12  ;;  %1251 = vmatmul.msk.f32.gmra.mxu3 %vm118_vm5, %v247_v12 }
 0x4d2   :  { %518 = vmatpush.msrb.mxu1 %v1443_v0 }
 0x4d4   :  { %519 = vmatpush.msrb.mxu1 %v1451_v2 }
 0x4d6   :  { %520 = vmatpush.msrb.mxu1 %v1463_v5 }
 0x4d8   :  { %521 = vmatpush.msrb.mxu1 %v1471_v6 }
 0x4dc   :  { %v102_v13 = vpop.f32.mrf.mxu0 }
 0x54e   :  { %v267_v15 = vpop.f32.mrf.mxu1 }
 0x54f   :  { %v270_v16 = vadd.f32 %v267_v15, %v97_v14  ;;  %v103_v14 = vadd.f32 %v1494_v8, %v102_v13 }
 0x551   :  { %v1233_v17 = vmul.f32 -1.442695, %v270_v16 }
 0x553   :  { %1301 = vpow2.f32 %v1233_v17 }
 0x559   :  { %v1302_v18 = vpop.eup %1301 }
 0x55a   :  { %v274_v19 = vadd.f32 1.0, %v1302_v18 }
 0x55c   :  { %1303 = vrcp.f32 %v274_v19  ;;  %v286_v23 = vand.u32 2147483648, %v274_v19  ;;  %v284_v25 = vand.u32 2147483647, %v274_v19  ;;  %vm280_vm11 = vweird.f32 %v274_v19 }
 0x55e   :  { %v287_v27 = vor.u32 1.1754944e-38, %v286_v23  ;;  %vm285_vm13 = vcmp.eq.f32.partialorder %v284_v25, 8.507059e+37 }
 0x562   :  { %v1304_v20 = vpop.eup %1303 }
 0x563   :  { %v276_v21 = vmul.f32 %v1304_v20, %v274_v19  ;;  %vm281_vm10 = vweird.f32 %v1304_v20 }
 0x564   :  { %vm282_vm12 = vmor %vm280_vm11, %vm281_vm10 }
 0x565   :  { %v277_v22 = vsub.f32 1.0, %v276_v21 }
 0x567   :  { %v278_v24 = vmul.f32 %v1304_v20, %v277_v22 }
 0x569   :  { %v279_v26 = vadd.f32 %v1304_v20, %v278_v24 }
 0x56b   :  { %v283_v28 = vsel %vm282_vm12, %v1304_v20, %v279_v26 }
 0x56c   :  { %v288_v29 = vsel %vm285_vm13, %v287_v27, %v283_v28 }
 0x56d   :  { %v290_v30 = vmul.f32 2.0, %v288_v29  ;;  %v292_v34 = vmul.f32 %v288_v29, %v238_v3 }
 0x56f   :  { %v1234_v31 = vadd.f32 -1.0, %v290_v30 }
 0x571   :  { %294 = vrot.lane.b32.xlu2 %v1234_v31, %s1387_s23 }
 0x5cb   :  { %v295_v32 = vpop.permute.xlu2 %294 }
 0x5cc   :  { %v297_v33 = vmul.f32 %v295_v32, %v288_v29 }
 0x5ce   :  { %299 = vrot.lane.b32.xlu0 %v297_v33, %s1388_s24 }
 0x640   :  { %v300_v35 = vpop.permute.xlu0 %299 }
 0x641   :  { %v302_v36 = vadd.f32 %v300_v35, %v292_v34 }
 0x643   :  { %1305 = vtanh.f32 %v302_v36 }
 0x649   :  { %v1306_v37 = vpop.eup %1305 }
 0x64a   :  { %305 = vrot.lane.b32.xlu1 %v1306_v37, %s1387_s23 }
 0x6bc   :  { %v306_v39 = vpop.permute.xlu1 %305 }
 0x6bd   :  { %v308_v40 = vmul.f32 %v306_v39, %v288_v29 }
 0x6bf   :  { %310 = vrot.lane.b32.xlu2 %v308_v40, %s1388_s24 }
 0x719   :  { %v311_v41 = vpop.permute.xlu2 %310 }
 0x71a   :  { %1235 = vmatmul.msk.f32.vlgmr.msra.gmra.mxu1 %vm118_vm5, %v311_v41  ;;  %1252 = vmatmul.msk.f32.gmra.mxu3 %vm118_vm5, %v311_v41 }
 0x797   :  { %v331_v44 = vpop.f32.mrf.mxu1 }
 0x798   :  { %v334_v45 = vadd.f32 %v331_v44, %v100_v43 }
 0x79a   :  { %v1236_v46 = vmul.f32 -1.442695, %v334_v45 }
 0x79c   :  { %1307 = vpow2.f32 %v1236_v46 }
 0x7a2   :  { %v1308_v47 = vpop.eup %1307 }
 0x7a3   :  { %v338_v48 = vadd.f32 1.0, %v1308_v47 }
 0x7a5   :  { %1309 = vrcp.f32 %v338_v48  ;;  %v350_v52 = vand.u32 2147483648, %v338_v48  ;;  %v348_v54 = vand.u32 2147483647, %v338_v48  ;;  %vm344_vm15 = vweird.f32 %v338_v48 }
 0x7a7   :  { %v351_v56 = vor.u32 1.1754944e-38, %v350_v52  ;;  %vm349_vm2 = vcmp.eq.f32.partialorder %v348_v54, 8.507059e+37 }
 0x7ab   :  { %v1310_v49 = vpop.eup %1309 }
 0x7ac   :  { %v340_v50 = vmul.f32 %v1310_v49, %v338_v48  ;;  %vm345_vm14 = vweird.f32 %v1310_v49 }
 0x7ad   :  { %vm346_vm1 = vmor %vm344_vm15, %vm345_vm14 }
 0x7ae   :  { %v341_v51 = vsub.f32 1.0, %v340_v50 }
 0x7b0   :  { %v342_v53 = vmul.f32 %v1310_v49, %v341_v51 }
 0x7b2   :  { %v343_v55 = vadd.f32 %v1310_v49, %v342_v53 }
 0x7b4   :  { %v347_v57 = vsel %vm346_vm1, %v1310_v49, %v343_v55 }
 0x7b5   :  { %v352_v58 = vsel %vm349_vm2, %v351_v56, %v347_v57 }
 0x7b6   :  { %v354_v59 = vmul.f32 2.0, %v352_v58  ;;  %v356_v63 = vmul.f32 %v352_v58, %v302_v36  ;;  %v39_v36 = vld [vmem:[%s1737_s0 + $0x28] sm:$0xff] }
 0x7b7   :  { %1224 = vmatmul.msk.f32.gmra.mxu0 %vm48_vm0, %v39_v36 }
 0x7b8   :  { %v1237_v60 = vadd.f32 -1.0, %v354_v59 }
 0x7ba   :  { %358 = vrot.lane.b32.xlu0 %v1237_v60, %s1387_s23 }
 0x82c   :  { %v359_v61 = vpop.permute.xlu0 %358 }
 0x82d   :  { %v361_v62 = vmul.f32 %v359_v61, %v352_v58 }
 0x82f   :  { %363 = vrot.lane.b32.xlu1 %v361_v62, %s1388_s24 }
 0x834   :  { %v105_v38 = vpop.f32.mrf.mxu0 }
 0x835   :  { %v106_v39 = vadd.f32 %v1494_v8, %v105_v38 }
 0x8a1   :  { %v364_v1 = vpop.permute.xlu1 %363 }
 0x8a2   :  { %v366_v3 = vadd.f32 %v364_v1, %v356_v63  ;;  %v40_v63 = vld [vmem:[%s1737_s0 + $0x30] sm:$0xff] }
 0x8a3   :  { %1225 = vmatmul.msk.f32.gmra.mxu0 %vm48_vm0, %v40_v63 }
 0x8a4   :  { %1311 = vtanh.f32 %v366_v3 }
 0x8aa   :  { %v1312_v4 = vpop.eup %1311 }
 0x8ab   :  { %369 = vrot.lane.b32.xlu2 %v1312_v4, %s1387_s23  ;;  %v1590_v4 = vld [vmem:[%s1741_s5 + $0x18] sm:$0xff] }
 0x8ac   :  { %699 = vmatpush.msra.mxu1 %v1590_v4 }
 0x905   :  { %v370_v9 = vpop.permute.xlu2 %369 }
 0x906   :  { %v372_v10 = vmul.f32 %v370_v9, %v352_v58  ;;  %v1595_v9 = vld [vmem:[%s1741_s5 + $0x10] sm:$0xff] }
 0x907   :  { %700 = vmatpush.msra.mxu1 %v1595_v9 }
 0x908   :  { %374 = vrot.lane.b32.xlu0 %v372_v10, %s1388_s24  ;;  %v1602_v10 = vld [vmem:[%s1741_s5 + $0x8] sm:$0xff] }
 0x909   :  { %701 = vmatpush.msra.mxu1 %v1602_v10 }
 0x90b   :  { %702 = vmatpush.msra.mxu1 %v1609_v11 }
 0x920   :  { %v108_v13 = vpop.f32.mrf.mxu0 }
 0x97a   :  { %v375_v12 = vpop.permute.xlu0 %374 }
 0x97b   :  { %1238 = vmatmul.msk.f32.vlgmr.msrb.gmra.mxu2 %vm118_vm5, %v375_v12  ;;  %1253 = vmatmul.msk.f32.gmra.mxu3 %vm118_vm5, %v375_v12 }
 0x97c   :  { %582 = vmatpush.msrb.mxu2 %v1443_v0 }
 0x97e   :  { %583 = vmatpush.msrb.mxu2 %v1451_v2 }
 0x980   :  { %584 = vmatpush.msrb.mxu2 %v1463_v5 }
 0x982   :  { %585 = vmatpush.msrb.mxu2 %v1471_v6 }
 0x9fe   :  { %v395_v15 = vpop.f32.mrf.mxu2 }
 0x9ff   :  { %v398_v16 = vadd.f32 %v395_v15, %v103_v14  ;;  %v109_v14 = vadd.f32 %v1494_v8, %v108_v13 }
 0xa01   :  { %v1239_v17 = vmul.f32 -1.442695, %v398_v16 }
 0xa03   :  { %1313 = vpow2.f32 %v1239_v17  ;;  %v1630_v17 = vld [vmem:[%s1740_s6] ss:$0 sm:$0xff] }
 0xa09   :  { %v1314_v18 = vpop.eup %1313 }
 0xa0a   :  { %v402_v19 = vadd.f32 1.0, %v1314_v18 }
 0xa0c   :  { %1315 = vrcp.f32 %v402_v19  ;;  %v414_v0 = vand.u32 2147483648, %v402_v19  ;;  %v412_v2 = vand.u32 2147483647, %v402_v19  ;;  %vm408_vm4 = vweird.f32 %v402_v19 }
 0xa0e   :  { %v415_v6 = vor.u32 1.1754944e-38, %v414_v0  ;;  %vm413_vm7 = vcmp.eq.f32.partialorder %v412_v2, 8.507059e+37 }
 0xa12   :  { %v1316_v20 = vpop.eup %1315 }
 0xa13   :  { %v404_v21 = vmul.f32 %v1316_v20, %v402_v19  ;;  %vm409_vm3 = vweird.f32 %v1316_v20 }
 0xa14   :  { %vm410_vm6 = vmor %vm408_vm4, %vm409_vm3 }
 0xa15   :  { %v405_v22 = vsub.f32 1.0, %v404_v21 }
 0xa17   :  { %v406_v23 = vmul.f32 %v1316_v20, %v405_v22 }
 0xa19   :  { %v407_v5 = vadd.f32 %v1316_v20, %v406_v23 }
 0xa1b   :  { %v411_v24 = vsel %vm410_vm6, %v1316_v20, %v407_v5 }
 0xa1c   :  { %v416_v25 = vsel %vm413_vm7, %v415_v6, %v411_v24 }
 0xa1d   :  { %v418_v26 = vmul.f32 2.0, %v416_v25  ;;  %v420_v30 = vmul.f32 %v416_v25, %v366_v3 }
 0xa1f   :  { %v1240_v27 = vadd.f32 -1.0, %v418_v26 }
 0xa21   :  { %422 = vrot.lane.b32.xlu1 %v1240_v27, %s1387_s23 }
 0xa93   :  { %v423_v28 = vpop.permute.xlu1 %422 }
 0xa94   :  { %v425_v29 = vmul.f32 %v423_v28, %v416_v25 }
 0xa96   :  { %427 = vrot.lane.b32.xlu2 %v425_v29, %s1388_s24 }
 0xaf0   :  { %v428_v31 = vpop.permute.xlu2 %427 }
 0xaf1   :  { %v430_v32 = vadd.f32 %v428_v31, %v420_v30 }
 0xaf3   :  { %1317 = vtanh.f32 %v430_v32 }
 0xaf9   :  { %v1318_v33 = vpop.eup %1317 }
 0xafa   :  { %433 = vrot.lane.b32.xlu0 %v1318_v33, %s1387_s23 }
 0xb6c   :  { %v434_v34 = vpop.permute.xlu0 %433 }
 0xb6d   :  { %v436_v35 = vmul.f32 %v434_v34, %v416_v25 }
 0xb6f   :  { %438 = vrot.lane.b32.xlu1 %v436_v35, %s1388_s24 }
 0xbe1   :  { %v439_v37 = vpop.permute.xlu1 %438 }
 0xbe2   :  { %1241 = vmatmul.msk.f32.vlgmr.msra.gmra.mxu2 %vm118_vm5, %v439_v37  ;;  %1254 = vmatmul.msk.f32.gmra.mxu3 %vm118_vm5, %v439_v37 }
 0xbe3   :  { %763 = vmatpush.msra.mxu2 %v1590_v4 }
 0xbe5   :  { %764 = vmatpush.msra.mxu2 %v1595_v9 }
 0xbe7   :  { %765 = vmatpush.msra.mxu2 %v1602_v10 }
 0xbe9   :  { %766 = vmatpush.msra.mxu2 %v1609_v11 }
 0xc65   :  { %v459_v40 = vpop.f32.mrf.mxu2 }
 0xc66   :  { %v462_v41 = vadd.f32 %v459_v40, %v106_v39 }
 0xc68   :  { %v1242_v42 = vmul.f32 -1.442695, %v462_v41 }
 0xc6a   :  { %1319 = vpow2.f32 %v1242_v42 }
 0xc70   :  { %v1320_v43 = vpop.eup %1319 }
 0xc71   :  { %v466_v44 = vadd.f32 1.0, %v1320_v43 }
 0xc73   :  { %1321 = vrcp.f32 %v466_v44  ;;  %v478_v48 = vand.u32 2147483648, %v466_v44  ;;  %v476_v50 = vand.u32 2147483647, %v466_v44  ;;  %vm472_vm9 = vweird.f32 %v466_v44 }
 0xc75   :  { %v479_v52 = vor.u32 1.1754944e-38, %v478_v48  ;;  %vm477_vm11 = vcmp.eq.f32.partialorder %v476_v50, 8.507059e+37 }
 0xc79   :  { %v1322_v45 = vpop.eup %1321 }
 0xc7a   :  { %v468_v46 = vmul.f32 %v1322_v45, %v466_v44  ;;  %vm473_vm8 = vweird.f32 %v1322_v45 }
 0xc7b   :  { %vm474_vm10 = vmor %vm472_vm9, %vm473_vm8 }
 0xc7c   :  { %v469_v47 = vsub.f32 1.0, %v468_v46 }
 0xc7e   :  { %v470_v49 = vmul.f32 %v1322_v45, %v469_v47 }
 0xc80   :  { %v471_v51 = vadd.f32 %v1322_v45, %v470_v49 }
 0xc82   :  { %v475_v53 = vsel %vm474_vm10, %v1322_v45, %v471_v51 }
 0xc83   :  { %v480_v54 = vsel %vm477_vm11, %v479_v52, %v475_v53 }
 0xc84   :  { %v482_v55 = vmul.f32 2.0, %v480_v54  ;;  %v484_v59 = vmul.f32 %v480_v54, %v430_v32 }
 0xc86   :  { %v1243_v56 = vadd.f32 -1.0, %v482_v55 }
 0xc88   :  { %486 = vrot.lane.b32.xlu2 %v1243_v56, %s1387_s23 }
 0xce2   :  { %v487_v57 = vpop.permute.xlu2 %486 }
 0xce3   :  { %v489_v58 = vmul.f32 %v487_v57, %v480_v54 }
 0xce5   :  { %491 = vrot.lane.b32.xlu0 %v489_v58, %s1388_s24 }
 0xd57   :  { %v492_v60 = vpop.permute.xlu0 %491 }
 0xd58   :  { %v1578_v61 = vadd.f32 %v492_v60, %v484_v59 }
 0xd5a   :  { %1323 = vtanh.f32 %v1578_v61 }
 0xd60   :  { %v1324_v62 = vpop.eup %1323 }
 0xd61   :  { %497 = vrot.lane.b32.xlu1 %v1324_v62, %s1387_s23  ;;  %v41_v62 = vld [vmem:[%s1737_s0 + $0x38] sm:$0xff] }
 0xd62   :  { %1226 = vmatmul.msk.f32.gmra.mxu0 %vm48_vm0, %v41_v62 }
 0xdd3   :  { %v498_v1 = vpop.permute.xlu1 %497 }
 0xdd4   :  { %v500_v3 = vmul.f32 %v498_v1, %v480_v54 }
 0xdd6   :  { %502 = vrot.lane.b32.xlu2 %v500_v3, %s1388_s24 }
 0xe30   :  { %v503_v12 = vpop.permute.xlu2 %502 }
 0xe31   :  { %1244 = vmatmul.msk.f32.vlgmr.msrb.gmra.mxu1 %vm118_vm5, %v503_v12  ;;  %1255 = vmatmul.msk.f32.gmra.mxu3 %vm118_vm5, %v503_v12 }
 0xe32   :  { %827 = vmatpush.msrb.mxu1 %v1590_v4 }
 0xe34   :  { %828 = vmatpush.msrb.mxu1 %v1595_v9 }
 0xe36   :  { %829 = vmatpush.msrb.mxu1 %v1602_v10 }
 0xe38   :  { %830 = vmatpush.msrb.mxu1 %v1609_v11 }
 0xe39   :  { %703 = vmatmul.f32.vlgmr.msra.gmra.mxu1 %v1386_v7  ;;  %v659_v7 = vpop.f32.mrf.mxu3 }
 0xe3a   :  { %955 = vmatpush.msra.mxu1 %v1590_v4  ;;  %v660_v19 = vadd.f32 %v1630_v17, %v659_v7 }
 0xe3c   :  { %956 = vmatpush.msra.mxu1 %v1595_v9 }
 0xe3e   :  { %957 = vmatpush.msra.mxu1 %v1602_v10 }
 0xe40   :  { %958 = vmatpush.msra.mxu1 %v1609_v11 }
 0xe41   :  { %v662_v12 = vpop.f32.mrf.mxu3 }
 0xe42   :  { %v663_v13 = vadd.f32 %v1630_v17, %v662_v12 }
 0xeae   :  { %v523_v15 = vpop.f32.mrf.mxu1 }
 0xeaf   :  { %v526_v16 = vadd.f32 %v523_v15, %v109_v14 }
 0xeb1   :  { %v1245_v18 = vmul.f32 -1.442695, %v526_v16 }
 0xeb3   :  { %1325 = vpow2.f32 %v1245_v18 }
 0xeb6   :  { %v704_v20 = vpop.f32.mrf.mxu1 }
 0xeb7   :  { %v707_v21 = vadd.f32 %v704_v20, %v660_v19 }
 0xeb9   :  { %v1326_v22 = vpop.eup %1325  ;;  %v1258_v0 = vmul.f32 -1.442695, %v707_v21 }
 0xeba   :  { %v530_v23 = vadd.f32 1.0, %v1326_v22 }
 0xebb   :  { %1327 = vpow2.f32 %v1258_v0 }
 0xebc   :  { %1329 = vrcp.f32 %v530_v23  ;;  %v542_v25 = vand.u32 2147483648, %v530_v23  ;;  %v540_v27 = vand.u32 2147483647, %v530_v23  ;;  %vm536_vm13 = vweird.f32 %v530_v23 }
 0xebe   :  { %v543_v30 = vor.u32 1.1754944e-38, %v542_v25  ;;  %vm541_vm15 = vcmp.eq.f32.partialorder %v540_v27, 8.507059e+37 }
 0xec1   :  { %v1328_v8 = vpop.eup %1327 }
 0xec2   :  { %v1330_v2 = vpop.eup %1329  ;;  %v711_v5 = vadd.f32 1.0, %v1328_v8 }
 0xec3   :  { %v532_v6 = vmul.f32 %v1330_v2, %v530_v23  ;;  %vm537_vm12 = vweird.f32 %v1330_v2 }
 0xec4   :  { %1331 = vrcp.f32 %v711_v5  ;;  %vm538_vm14 = vmor %vm536_vm13, %vm537_vm12  ;;  %v723_v36 = vand.u32 2147483648, %v711_v5  ;;  %v721_v39 = vand.u32 2147483647, %v711_v5  ;;  %vm717_vm2 = vweird.f32 %v711_v5 }
 0xec5   :  { %v533_v24 = vsub.f32 1.0, %v532_v6 }
 0xec6   :  { %v724_v41 = vor.u32 1.1754944e-38, %v723_v36  ;;  %vm722_vm4 = vcmp.eq.f32.partialorder %v721_v39, 8.507059e+37 }
 0xec7   :  { %v534_v26 = vmul.f32 %v1330_v2, %v533_v24 }
 0xec9   :  { %v535_v28 = vadd.f32 %v1330_v2, %v534_v26 }
 0xeca   :  { %v1332_v29 = vpop.eup %1331 }
 0xecb   :  { %v713_v31 = vmul.f32 %v1332_v29, %v711_v5  ;;  %v539_v32 = vsel %vm538_vm14, %v1330_v2, %v535_v28  ;;  %vm718_vm1 = vweird.f32 %v1332_v29 }
 0xecc   :  { %v544_v33 = vsel %vm541_vm15, %v543_v30, %v539_v32  ;;  %vm719_vm3 = vmor %vm717_vm2, %vm718_vm1 }
 0xecd   :  { %v714_v34 = vsub.f32 1.0, %v713_v31  ;;  %v546_v35 = vmul.f32 2.0, %v544_v33  ;;  %v548_v50 = vmul.f32 %v544_v33, %v1578_v61 }
 0xecf   :  { %v1246_v37 = vadd.f32 -1.0, %v546_v35  ;;  %v715_v38 = vmul.f32 %v1332_v29, %v714_v34  ;;  %v665_v35 = vpop.f32.mrf.mxu3 }
 0xed0   :  { %v666_v36 = vadd.f32 %v1630_v17, %v665_v35 }
 0xed1   :  { %550 = vrot.lane.b32.xlu0 %v1246_v37, %s1387_s23  ;;  %v716_v40 = vadd.f32 %v1332_v29, %v715_v38 }
 0xed3   :  { %v720_v42 = vsel %vm719_vm3, %v1332_v29, %v716_v40 }
 0xed4   :  { %v725_v43 = vsel %vm722_vm4, %v724_v41, %v720_v42 }
 0xed5   :  { %v727_v44 = vmul.f32 2.0, %v725_v43  ;;  %v729_v54 = vmul.f32 0.0, %v725_v43 }
 0xed7   :  { %v1259_v45 = vadd.f32 -1.0, %v727_v44 }
 0xed9   :  { %731 = vrot.lane.b32.xlu1 %v1259_v45, %s1387_s23 }
 0xf43   :  { %v551_v46 = vpop.permute.xlu0 %550 }
 0xf44   :  { %v553_v47 = vmul.f32 %v551_v46, %v544_v33 }
 0xf46   :  { %555 = vrot.lane.b32.xlu2 %v553_v47, %s1388_s24 }
 0xf4b   :  { %v732_v48 = vpop.permute.xlu1 %731 }
 0xf4c   :  { %v734_v49 = vmul.f32 %v732_v48, %v725_v43 }
 0xf4e   :  { %736 = vrot.lane.b32.xlu0 %v734_v49, %s1388_s24 }
 0xfa0   :  { %v556_v51 = vpop.permute.xlu2 %555 }
 0xfa1   :  { %v1638_v52 = vadd.f32 %v556_v51, %v548_v50 }
 0xfa3   :  { %1333 = vtanh.f32 %v1638_v52 }
 0xfa9   :  { %v1334_v53 = vpop.eup %1333 }
 0xfaa   :  { %561 = vrot.lane.b32.xlu1 %v1334_v53, %s1387_s23 }
 0xfc0   :  { %v737_v55 = vpop.permute.xlu0 %736 }
 0xfc1   :  { %v739_v56 = vadd.f32 %v737_v55, %v729_v54 }
 0xfc3   :  { %1335 = vtanh.f32 %v739_v56 }
 0xfc9   :  { %v1336_v57 = vpop.eup %1335 }
 0xfca   :  { %742 = vrot.lane.b32.xlu2 %v1336_v57, %s1387_s23 }
0x101c   :  { %v562_v58 = vpop.permute.xlu1 %561 }
0x101d   :  { %v564_v59 = vmul.f32 %v562_v58, %v544_v33 }
0x101f   :  { %566 = vrot.lane.b32.xlu0 %v564_v59, %s1388_s24 }
0x1024   :  { %v743_v60 = vpop.permute.xlu2 %742 }
0x1025   :  { %v745_v61 = vmul.f32 %v743_v60, %v725_v43 }
0x1027   :  { %747 = vrot.lane.b32.xlu1 %v745_v61, %s1388_s24 }
0x1091   :  { %v567_v63 = vpop.permute.xlu0 %566 }
0x1092   :  { %1247 = vmatmul.msk.f32.vlgmr.msrb.gmra.mxu2 %vm118_vm5, %v567_v63  ;;  %1256 = vmatmul.msk.f32.gmra.mxu3 %vm118_vm5, %v567_v63 }
0x1093   :  { %891 = vmatpush.msrb.mxu2 %v1590_v4 }
0x1095   :  { %892 = vmatpush.msrb.mxu2 %v1595_v9 }
0x1097   :  { %893 = vmatpush.msrb.mxu2 %v1602_v10 }
0x1099   :  { %v748_v1 = vpop.permute.xlu1 %747  ;;  %894 = vmatpush.msrb.mxu2 %v1609_v11 }
0x109a   :  { %1260 = vmatmul.msk.f32.vlgmr.msra.gmra.mxu2 %vm118_vm5, %v748_v1  ;;  %v668_v1 = vpop.f32.mrf.mxu3 }
0x109b   :  { %1019 = vmatpush.msra.mxu2 %v1590_v4  ;;  %v669_v12 = vadd.f32 %v1630_v17, %v668_v1 }
0x109d   :  { %1020 = vmatpush.msra.mxu2 %v1595_v9 }
0x109f   :  { %1021 = vmatpush.msra.mxu2 %v1602_v10 }
0x10a1   :  { %1022 = vmatpush.msra.mxu2 %v1609_v11 }
0x1115   :  { %v1660_v3 = vpop.f32.mrf.mxu2 }
0x111d   :  { %v768_v14 = vpop.f32.mrf.mxu2 }
0x111e   :  { %v771_v15 = vadd.f32 %v768_v14, %v663_v13 }
0x1120   :  { %v1261_v16 = vmul.f32 -1.442695, %v771_v15 }
0x1122   :  { %1337 = vpow2.f32 %v1261_v16 }
0x1128   :  { %v1338_v18 = vpop.eup %1337 }
0x1129   :  { %v775_v7 = vadd.f32 1.0, %v1338_v18 }
0x112b   :  { %1339 = vrcp.f32 %v775_v7  ;;  %v787_v22 = vand.u32 2147483648, %v775_v7  ;;  %v785_v23 = vand.u32 2147483647, %v775_v7  ;;  %vm781_vm6 = vweird.f32 %v775_v7 }
0x112d   :  { %v788_v2 = vor.u32 1.1754944e-38, %v787_v22  ;;  %vm786_vm8 = vcmp.eq.f32.partialorder %v785_v23, 8.507059e+37 }
0x1131   :  { %v1340_v19 = vpop.eup %1339 }
0x1132   :  { %v777_v20 = vmul.f32 %v1340_v19, %v775_v7  ;;  %vm782_vm0 = vweird.f32 %v1340_v19 }
0x1133   :  { %vm783_vm7 = vmor %vm781_vm6, %vm782_vm0 }
0x1134   :  { %v778_v21 = vsub.f32 1.0, %v777_v20 }
0x1136   :  { %v779_v0 = vmul.f32 %v1340_v19, %v778_v21 }
0x1138   :  { %v780_v8 = vadd.f32 %v1340_v19, %v779_v0 }
0x113a   :  { %v784_v5 = vsel %vm783_vm7, %v1340_v19, %v780_v8 }
0x113b   :  { %v789_v6 = vsel %vm786_vm8, %v788_v2, %v784_v5 }
0x113c   :  { %v791_v24 = vmul.f32 2.0, %v789_v6  ;;  %v793_v28 = vmul.f32 %v789_v6, %v739_v56 }
0x113e   :  { %v1262_v25 = vadd.f32 -1.0, %v791_v24 }
0x1140   :  { %795 = vrot.lane.b32.xlu2 %v1262_v25, %s1387_s23 }
0x119a   :  { %v796_v26 = vpop.permute.xlu2 %795 }
0x119b   :  { %v798_v27 = vmul.f32 %v796_v26, %v789_v6 }
0x119d   :  { %800 = vrot.lane.b32.xlu0 %v798_v27, %s1388_s24 }
0x120f   :  { %v801_v29 = vpop.permute.xlu0 %800 }
0x1210   :  { %v803_v30 = vadd.f32 %v801_v29, %v793_v28 }
0x1212   :  { %1341 = vtanh.f32 %v803_v30 }
0x1218   :  { %v1342_v31 = vpop.eup %1341 }
0x1219   :  { %806 = vrot.lane.b32.xlu1 %v1342_v31, %s1387_s23 }
0x128b   :  { %v807_v32 = vpop.permute.xlu1 %806 }
0x128c   :  { %v809_v33 = vmul.f32 %v807_v32, %v789_v6 }
0x128e   :  { %811 = vrot.lane.b32.xlu2 %v809_v33, %s1388_s24 }
0x12e8   :  { %v812_v34 = vpop.permute.xlu2 %811 }
0x12e9   :  { %1263 = vmatmul.msk.f32.vlgmr.msrb.gmra.mxu1 %vm118_vm5, %v812_v34 }
0x12ea   :  { %1083 = vmatpush.msrb.mxu1 %v1590_v4 }
0x12ec   :  { %1084 = vmatpush.msrb.mxu1 %v1595_v9 }
0x12ee   :  { %1085 = vmatpush.msrb.mxu1 %v1602_v10 }
0x12f0   :  { %1086 = vmatpush.msrb.mxu1 %v1609_v11 }
0x1366   :  { %v832_v37 = vpop.f32.mrf.mxu1 }
0x1367   :  { %v835_v38 = vadd.f32 %v832_v37, %v666_v36 }
0x1369   :  { %v1264_v39 = vmul.f32 -1.442695, %v835_v38 }
0x136b   :  { %1343 = vpow2.f32 %v1264_v39 }
0x1371   :  { %v1344_v40 = vpop.eup %1343 }
0x1372   :  { %v839_v41 = vadd.f32 1.0, %v1344_v40 }
0x1374   :  { %1345 = vrcp.f32 %v839_v41  ;;  %v851_v45 = vand.u32 2147483648, %v839_v41  ;;  %v849_v47 = vand.u32 2147483647, %v839_v41  ;;  %vm845_vm10 = vweird.f32 %v839_v41 }
0x1376   :  { %v852_v49 = vor.u32 1.1754944e-38, %v851_v45  ;;  %vm850_vm12 = vcmp.eq.f32.partialorder %v849_v47, 8.507059e+37 }
0x137a   :  { %v1346_v42 = vpop.eup %1345 }
0x137b   :  { %v841_v43 = vmul.f32 %v1346_v42, %v839_v41  ;;  %vm846_vm9 = vweird.f32 %v1346_v42 }
0x137c   :  { %vm847_vm11 = vmor %vm845_vm10, %vm846_vm9 }
0x137d   :  { %v842_v44 = vsub.f32 1.0, %v841_v43 }
0x137f   :  { %v843_v46 = vmul.f32 %v1346_v42, %v842_v44 }
0x1381   :  { %v844_v48 = vadd.f32 %v1346_v42, %v843_v46 }
0x1383   :  { %v848_v50 = vsel %vm847_vm11, %v1346_v42, %v844_v48 }
0x1384   :  { %v853_v51 = vsel %vm850_vm12, %v852_v49, %v848_v50 }
0x1385   :  { %v855_v53 = vmul.f32 2.0, %v853_v51  ;;  %v857_v57 = vmul.f32 %v853_v51, %v803_v30  ;;  %v671_v30 = vpop.f32.mrf.mxu3 }
0x1386   :  { %v672_v31 = vadd.f32 %v1630_v17, %v671_v30 }
0x1387   :  { %v1265_v54 = vadd.f32 -1.0, %v855_v53 }
0x1389   :  { %859 = vrot.lane.b32.xlu0 %v1265_v54, %s1387_s23 }
0x13fb   :  { %v860_v55 = vpop.permute.xlu0 %859 }
0x13fc   :  { %v862_v56 = vmul.f32 %v860_v55, %v853_v51 }
0x13fe   :  { %864 = vrot.lane.b32.xlu1 %v862_v56, %s1388_s24 }
0x1470   :  { %v865_v58 = vpop.permute.xlu1 %864 }
0x1471   :  { %v867_v59 = vadd.f32 %v865_v58, %v857_v57 }
0x1473   :  { %1347 = vtanh.f32 %v867_v59 }
0x1479   :  { %v1348_v60 = vpop.eup %1347 }
0x147a   :  { %870 = vrot.lane.b32.xlu2 %v1348_v60, %s1387_s23 }
0x14d4   :  { %v871_v61 = vpop.permute.xlu2 %870 }
0x14d5   :  { %v873_v62 = vmul.f32 %v871_v61, %v853_v51 }
0x14d7   :  { %875 = vrot.lane.b32.xlu0 %v873_v62, %s1388_s24 }
0x1549   :  { %v876_v63 = vpop.permute.xlu0 %875 }
0x154a   :  { %1266 = vmatmul.msk.f32.vlgmr.msrb.gmra.mxu2 %vm118_vm5, %v876_v63 }
0x154b   :  { %1147 = vmatpush.msrb.mxu2 %v1590_v4 }
0x154d   :  { %1148 = vmatpush.msrb.mxu2 %v1595_v9 }
0x154f   :  { %1149 = vmatpush.msrb.mxu2 %v1602_v10 }
0x1551   :  { %1150 = vmatpush.msrb.mxu2 %v1609_v11 }
0x15cd   :  { %v896_v13 = vpop.f32.mrf.mxu2 }
0x15ce   :  { %v899_v14 = vadd.f32 %v896_v13, %v669_v12 }
0x15d0   :  { %v1267_v15 = vmul.f32 -1.442695, %v899_v14 }
0x15d2   :  { %1349 = vpow2.f32 %v1267_v15 }
0x15d8   :  { %v1350_v16 = vpop.eup %1349 }
0x15d9   :  { %v903_v18 = vadd.f32 1.0, %v1350_v16 }
0x15db   :  { %1351 = vrcp.f32 %v903_v18  ;;  %v915_v4 = vand.u32 2147483648, %v903_v18  ;;  %v913_v9 = vand.u32 2147483647, %v903_v18  ;;  %vm909_vm14 = vweird.f32 %v903_v18 }
0x15dd   :  { %v916_v11 = vor.u32 1.1754944e-38, %v915_v4  ;;  %vm914_vm1 = vcmp.eq.f32.partialorder %v913_v9, 8.507059e+37 }
0x15e1   :  { %v1352_v7 = vpop.eup %1351 }
0x15e2   :  { %v905_v19 = vmul.f32 %v1352_v7, %v903_v18  ;;  %vm910_vm13 = vweird.f32 %v1352_v7 }
0x15e3   :  { %vm911_vm15 = vmor %vm909_vm14, %vm910_vm13 }
0x15e4   :  { %v906_v20 = vsub.f32 1.0, %v905_v19 }
0x15e6   :  { %v907_v21 = vmul.f32 %v1352_v7, %v906_v20 }
0x15e8   :  { %v908_v10 = vadd.f32 %v1352_v7, %v907_v21 }
0x15ea   :  { %v912_v22 = vsel %vm911_vm15, %v1352_v7, %v908_v10 }
0x15eb   :  { %v917_v0 = vsel %vm914_vm1, %v916_v11, %v912_v22  ;;  %v111_v11 = vpop.f32.mrf.mxu0  ;;  %v1385_v22 = vld [vmem:[%s1738_s3] ss:$0 sm:$0xff] }
0x15ec   :  { %v919_v23 = vmul.f32 2.0, %v917_v0  ;;  %v921_v6 = vmul.f32 %v917_v0, %v867_v59  ;;  %v674_v59 = vpop.f32.mrf.mxu3 }
0x15ed   :  { %v675_v60 = vadd.f32 %v1630_v17, %v674_v59 }
0x15ee   :  { %v1268_v8 = vadd.f32 -1.0, %v919_v23 }
0x15f0   :  { %923 = vrot.lane.b32.xlu1 %v1268_v8, %s1387_s23 }
0x1662   :  { %v924_v2 = vpop.permute.xlu1 %923 }
0x1663   :  { %v926_v5 = vmul.f32 %v924_v2, %v917_v0 }
0x1665   :  { %928 = vrot.lane.b32.xlu2 %v926_v5, %s1388_s24 }
0x16bf   :  { %v929_v24 = vpop.permute.xlu2 %928 }
0x16c0   :  { %v931_v25 = vadd.f32 %v929_v24, %v921_v6 }
0x16c2   :  { %1353 = vtanh.f32 %v931_v25 }
0x16c8   :  { %v1354_v26 = vpop.eup %1353 }
0x16c9   :  { %934 = vrot.lane.b32.xlu0 %v1354_v26, %s1387_s23 }
0x173b   :  { %v935_v27 = vpop.permute.xlu0 %934 }
0x173c   :  { %v937_v28 = vmul.f32 %v935_v27, %v917_v0  ;;  %v112_v0 = vadd.f32 %v1385_v22, %v111_v11 }
0x173e   :  { %939 = vrot.lane.b32.xlu1 %v937_v28, %s1388_s24  ;;  %v590_v23 = vadd.f32 %v1660_v3, %v112_v0 }
0x1740   :  { %v1248_v8 = vmul.f32 -1.442695, %v590_v23 }
0x17b0   :  { %v940_v29 = vpop.permute.xlu1 %939 }
0x17b1   :  { %1269 = vmatmul.msk.f32.vlgmr.msra.gmra.mxu1 %vm118_vm5, %v940_v29 }
0x182e   :  { %v960_v32 = vpop.f32.mrf.mxu1 }
0x182f   :  { %v963_v33 = vadd.f32 %v960_v32, %v672_v31 }
0x1831   :  { %v1270_v34 = vmul.f32 -1.442695, %v963_v33 }
0x1833   :  { %1355 = vpow2.f32 %v1270_v34 }
0x1839   :  { %v1356_v35 = vpop.eup %1355 }
0x183a   :  { %v967_v36 = vadd.f32 1.0, %v1356_v35 }
0x183c   :  { %1357 = vrcp.f32 %v967_v36  ;;  %v979_v40 = vand.u32 2147483648, %v967_v36  ;;  %v977_v42 = vand.u32 2147483647, %v967_v36  ;;  %vm973_vm3 = vweird.f32 %v967_v36 }
0x183e   :  { %v980_v44 = vor.u32 1.1754944e-38, %v979_v40  ;;  %vm978_vm0 = vcmp.eq.f32.partialorder %v977_v42, 8.507059e+37 }
0x1842   :  { %v1358_v37 = vpop.eup %1357 }
0x1843   :  { %v969_v38 = vmul.f32 %v1358_v37, %v967_v36  ;;  %vm974_vm2 = vweird.f32 %v1358_v37 }
0x1844   :  { %vm975_vm4 = vmor %vm973_vm3, %vm974_vm2 }
0x1845   :  { %v970_v39 = vsub.f32 1.0, %v969_v38 }
0x1847   :  { %v971_v41 = vmul.f32 %v1358_v37, %v970_v39 }
0x1849   :  { %v972_v43 = vadd.f32 %v1358_v37, %v971_v41 }
0x184b   :  { %v976_v45 = vsel %vm975_vm4, %v1358_v37, %v972_v43 }
0x184c   :  { %v981_v46 = vsel %vm978_vm0, %v980_v44, %v976_v45  ;;  %v677_v45 = vpop.f32.mrf.mxu3 }
0x184d   :  { %v983_v47 = vmul.f32 2.0, %v981_v46  ;;  %v985_v51 = vmul.f32 %v981_v46, %v931_v25 }
0x184f   :  { %v1271_v48 = vadd.f32 -1.0, %v983_v47 }
0x1851   :  { %987 = vrot.lane.b32.xlu2 %v1271_v48, %s1387_s23 }
0x18ab   :  { %v988_v49 = vpop.permute.xlu2 %987 }
0x18ac   :  { %v990_v50 = vmul.f32 %v988_v49, %v981_v46 }
0x18ae   :  { %992 = vrot.lane.b32.xlu0 %v990_v50, %s1388_s24 }
0x1920   :  { %v993_v53 = vpop.permute.xlu0 %992 }
0x1921   :  { %v1691_v54 = vadd.f32 %v993_v53, %v985_v51 }
0x1923   :  { %1359 = vtanh.f32 %v1691_v54 }
0x1929   :  { %v1360_v55 = vpop.eup %1359 }
0x192a   :  { %998 = vrot.lane.b32.xlu1 %v1360_v55, %s1387_s23 }
0x199c   :  { %v999_v56 = vpop.permute.xlu1 %998 }
0x199d   :  { %v1001_v57 = vmul.f32 %v999_v56, %v981_v46  ;;  %v678_v46 = vadd.f32 %v1630_v17, %v677_v45 }
0x199f   :  { %1003 = vrot.lane.b32.xlu2 %v1001_v57, %s1388_s24 }
0x19f9   :  { %v1004_v58 = vpop.permute.xlu2 %1003 }
0x19fa   :  { %1272 = vmatmul.msk.f32.vlgmr.msra.gmra.mxu2 %vm118_vm5, %v1004_v58 }
0x1a7d   :  { %v1024_v61 = vpop.f32.mrf.mxu2 }
0x1a7e   :  { %v1027_v62 = vadd.f32 %v1024_v61, %v675_v60 }
0x1a80   :  { %v1273_v63 = vmul.f32 -1.442695, %v1027_v62 }
0x1a82   :  { %1361 = vpow2.f32 %v1273_v63 }
0x1a88   :  { %v1362_v1 = vpop.eup %1361 }
0x1a89   :  { %v1031_v12 = vadd.f32 1.0, %v1362_v1 }
0x1a8b   :  { %1363 = vrcp.f32 %v1031_v12  ;;  %v1043_v16 = vand.u32 2147483648, %v1031_v12  ;;  %v1041_v7 = vand.u32 2147483647, %v1031_v12  ;;  %vm1037_vm7 = vweird.f32 %v1031_v12 }
0x1a8c   :  { %1365 = vpow2.f32 %v1248_v8 }
0x1a8d   :  { %v1044_v20 = vor.u32 1.1754944e-38, %v1043_v16  ;;  %vm1042_vm9 = vcmp.eq.f32.partialorder %v1041_v7, 8.507059e+37 }
0x1a91   :  { %v1364_v13 = vpop.eup %1363 }
0x1a92   :  { %v1033_v14 = vmul.f32 %v1364_v13, %v1031_v12  ;;  %vm1038_vm6 = vweird.f32 %v1364_v13  ;;  %v1366_v2 = vpop.eup %1365 }
0x1a93   :  { %vm1039_vm8 = vmor %vm1037_vm7, %vm1038_vm6  ;;  %v594_v5 = vadd.f32 1.0, %v1366_v2  ;;  %vm1213_vm7 = vcmask 7168  }
0x1a94   :  { %v1034_v15 = vsub.f32 1.0, %v1033_v14 }
0x1a95   :  { %1367 = vrcp.f32 %v594_v5  ;;  %v606_v28 = vand.u32 2147483648, %v594_v5  ;;  %vm600_vm11 = vweird.f32 %v594_v5  ;;  %v604_v29 = vand.u32 2147483647, %v594_v5 }
0x1a96   :  { %v1035_v18 = vmul.f32 %v1364_v13, %v1034_v15 }
0x1a97   :  { %v607_v32 = vor.u32 1.1754944e-38, %v606_v28  ;;  %vm605_vm13 = vcmp.eq.f32.partialorder %v604_v29, 8.507059e+37 }
0x1a98   :  { %v1036_v19 = vadd.f32 %v1364_v13, %v1035_v18 }
0x1a9a   :  { %v1040_v4 = vsel %vm1039_vm8, %v1364_v13, %v1036_v19 }
0x1a9b   :  { %v1045_v21 = vsel %vm1042_vm9, %v1044_v20, %v1040_v4  ;;  %v1368_v6 = vpop.eup %1367 }
0x1a9c   :  { %v1047_v9 = vmul.f32 2.0, %v1045_v21  ;;  %v596_v24 = vmul.f32 %v1368_v6, %v594_v5  ;;  %vm601_vm10 = vweird.f32 %v1368_v6  ;;  %v1049_v36 = vmul.f32 %v1045_v21, %v1691_v54 }
0x1a9d   :  { %vm602_vm12 = vmor %vm600_vm11, %vm601_vm10 }
0x1a9e   :  { %v1274_v10 = vadd.f32 -1.0, %v1047_v9  ;;  %v597_v25 = vsub.f32 1.0, %v596_v24 }
0x1aa0   :  { %1051 = vrot.lane.b32.xlu0 %v1274_v10, %s1387_s23  ;;  %v598_v26 = vmul.f32 %v1368_v6, %v597_v25 }
0x1aa2   :  { %v599_v27 = vadd.f32 %v1368_v6, %v598_v26 }
0x1aa4   :  { %v603_v30 = vsel %vm602_vm12, %v1368_v6, %v599_v27 }
0x1aa5   :  { %v608_v3 = vsel %vm605_vm13, %v607_v32, %v603_v30 }
0x1aa6   :  { %v610_v34 = vmul.f32 2.0, %v608_v3  ;;  %v612_v63 = vmul.f32 %v608_v3, %v1638_v52 }
0x1aa8   :  { %v1249_v35 = vadd.f32 -1.0, %v610_v34 }
0x1b12   :  { %v1052_v31 = vpop.permute.xlu0 %1051 }
0x1b13   :  { %v1054_v33 = vmul.f32 %v1052_v31, %v1045_v21 }
0x1b15   :  { %1056 = vrot.lane.b32.xlu1 %v1054_v33, %s1388_s24 }
0x1b1d   :  { %614 = vrot.lane.b32.xlu1 %v1249_v35, %s1387_s23  ;;  %v1287_v35 = vld [vmem:[%s1742_s7] ss:$0 sm:$0xff] }
0x1b87   :  { %v1057_v37 = vpop.permute.xlu1 %1056 }
0x1b88   :  { %v1059_v38 = vadd.f32 %v1057_v37, %v1049_v36 }
0x1b8a   :  { %1369 = vtanh.f32 %v1059_v38 }
0x1b8f   :  { %v615_v42 = vpop.permute.xlu1 %614 }
0x1b90   :  { %v1370_v39 = vpop.eup %1369  ;;  %v617_v43 = vmul.f32 %v615_v42, %v608_v3 }
0x1b91   :  { %1062 = vrot.lane.b32.xlu2 %v1370_v39, %s1387_s23 }
0x1beb   :  { %v1063_v40 = vpop.permute.xlu2 %1062 }
0x1bec   :  { %v1065_v41 = vmul.f32 %v1063_v40, %v1045_v21 }
0x1bee   :  { %1067 = vrot.lane.b32.xlu0 %v1065_v41, %s1388_s24 }
0x1bf6   :  { %619 = vrot.lane.b32.xlu0 %v617_v43, %s1388_s24 }
0x1c60   :  { %v1068_v44 = vpop.permute.xlu0 %1067 }
0x1c61   :  { %1275 = vmatmul.msk.f32.vlgmr.msrb.gmra.mxu1 %vm118_vm5, %v1068_v44 }
0x1c68   :  { %v620_v61 = vpop.permute.xlu0 %619 }
0x1c69   :  { %v622_v13 = vadd.f32 %v620_v61, %v612_v63 }
0x1cde   :  { %v1088_v47 = vpop.f32.mrf.mxu1 }
0x1cdf   :  { %v1091_v48 = vadd.f32 %v1088_v47, %v678_v46  ;;  %v14_v46 = vstv %s1743_s8 }
0x1ce0   :  { %15 = vst [vmem:[#allocation2] sm:$0x1] %v14_v46 }
0x1ce1   :  { %v1276_v49 = vmul.f32 -1.442695, %v1091_v48 }
0x1ce3   :  { %1371 = vpow2.f32 %v1276_v49 }
0x1ce7   :  { %v1288_v49 = vld [vmem:[#allocation2] ss:$0 sm:$0xff] }
0x1ce9   :  { %v1372_v50 = vpop.eup %1371 }
0x1cea   :  { %v1095_v51 = vadd.f32 1.0, %v1372_v50 }
0x1cec   :  { %1373 = vrcp.f32 %v1095_v51  ;;  %v1107_v56 = vand.u32 2147483648, %v1095_v51  ;;  %v1105_v58 = vand.u32 2147483647, %v1095_v51  ;;  %vm1101_vm15 = vweird.f32 %v1095_v51 }
0x1ced   :  { %1375 = vtanh.f32 %v622_v13 }
0x1cee   :  { %v1108_v60 = vor.u32 1.1754944e-38, %v1107_v56  ;;  %vm1106_vm2 = vcmp.eq.f32.partialorder %v1105_v58, 8.507059e+37 }
0x1cf2   :  { %v1374_v53 = vpop.eup %1373 }
0x1cf3   :  { %v1097_v54 = vmul.f32 %v1374_v53, %v1095_v51  ;;  %vm1102_vm14 = vweird.f32 %v1374_v53  ;;  %v1376_v15 = vpop.eup %1375 }
0x1cf4   :  { %vm1103_vm1 = vmor %vm1101_vm15, %vm1102_vm14 }
0x1cf5   :  { %v1098_v55 = vsub.f32 1.0, %v1097_v54 }
0x1cf7   :  { %v1099_v57 = vmul.f32 %v1374_v53, %v1098_v55 }
0x1cf9   :  { %v1100_v59 = vadd.f32 %v1374_v53, %v1099_v57 }
0x1cfb   :  { %v1104_v62 = vsel %vm1103_vm1, %v1374_v53, %v1100_v59 }
0x1cfc   :  { %v1109_v1 = vsel %vm1106_vm2, %v1108_v60, %v1104_v62 }
0x1cfd   :  { %v1111_v12 = vmul.f32 2.0, %v1109_v1  ;;  %v1113_v20 = vmul.f32 %v1109_v1, %v1059_v38 }
0x1cff   :  { %v1277_v14 = vadd.f32 -1.0, %v1111_v12 }
0x1d01   :  { %1115 = vrot.lane.b32.xlu2 %v1277_v14, %s1387_s23 }
0x1d09   :  { %625 = vrot.lane.b32.xlu2 %v1376_v15, %s1387_s23 }
0x1d5b   :  { %v1116_v16 = vpop.permute.xlu2 %1115 }
0x1d5c   :  { %v1118_v18 = vmul.f32 %v1116_v16, %v1109_v1 }
0x1d5e   :  { %1120 = vrot.lane.b32.xlu1 %v1118_v18, %s1388_s24 }
0x1d63   :  { %v626_v7 = vpop.permute.xlu2 %625 }
0x1d64   :  { %v628_v19 = vmul.f32 %v626_v7, %v608_v3 }
0x1d66   :  { %638 = vrot.lane.b32.xlu1 %v628_v19, %s1388_s24 }
0x1dd0   :  { %v1121_v52 = vpop.permute.xlu1 %1120 }
0x1dd1   :  { %v1123_v4 = vadd.f32 %v1121_v52, %v1113_v20 }
0x1dd3   :  { %1377 = vtanh.f32 %v1123_v4 }
0x1dd8   :  { %v639_v21 = vpop.permute.xlu1 %638 }
0x1dd9   :  { %v1378_v9 = vpop.eup %1377  ;;  %1257 = vmatmul.msk.f32.gmra.mxu3 %vm118_vm5, %v639_v21 }
0x1dda   :  { %1126 = vrot.lane.b32.xlu0 %v1378_v9, %s1387_s23 }
0x1e4c   :  { %v1127_v10 = vpop.permute.xlu0 %1126 }
0x1e4d   :  { %v1129_v11 = vmul.f32 %v1127_v10, %v1109_v1 }
0x1e4f   :  { %1131 = vrot.lane.b32.xlu2 %v1129_v11, %s1388_s24 }
0x1e5c   :  { %v680_v0 = vpop.f32.mrf.mxu3 }
0x1e5d   :  { %v681_v23 = vadd.f32 %v1630_v17, %v680_v0 }
0x1ea9   :  { %v1132_v22 = vpop.permute.xlu2 %1131 }
0x1eaa   :  { %1278 = vmatmul.msk.f32.vlgmr.msrb.gmra.mxu2 %vm118_vm5, %v1132_v22 }
0x1f2d   :  { %v1152_v8 = vpop.f32.mrf.mxu2 }
0x1f2e   :  { %v1155_v2 = vadd.f32 %v1152_v8, %v681_v23 }
0x1f30   :  { %v1279_v5 = vmul.f32 -1.442695, %v1155_v2 }
0x1f32   :  { %1379 = vpow2.f32 %v1279_v5 }
0x1f38   :  { %v1380_v6 = vpop.eup %1379 }
0x1f39   :  { %v1159_v24 = vadd.f32 1.0, %v1380_v6 }
0x1f3b   :  { %1381 = vrcp.f32 %v1159_v24  ;;  %v1171_v28 = vand.u32 2147483648, %v1159_v24  ;;  %v1169_v30 = vand.u32 2147483647, %v1159_v24  ;;  %vm1165_vm4 = vweird.f32 %v1159_v24 }
0x1f3d   :  { %v1172_v32 = vor.u32 1.1754944e-38, %v1171_v28  ;;  %vm1170_vm6 = vcmp.eq.f32.partialorder %v1169_v30, 8.507059e+37 }
0x1f41   :  { %v1382_v25 = vpop.eup %1381 }
0x1f42   :  { %v1161_v26 = vmul.f32 %v1382_v25, %v1159_v24  ;;  %vm1166_vm3 = vweird.f32 %v1382_v25 }
0x1f43   :  { %vm1167_vm0 = vmor %vm1165_vm4, %vm1166_vm3 }
0x1f44   :  { %v1162_v27 = vsub.f32 1.0, %v1161_v26 }
0x1f46   :  { %v1163_v29 = vmul.f32 %v1382_v25, %v1162_v27 }
0x1f48   :  { %v1164_v31 = vadd.f32 %v1382_v25, %v1163_v29 }
0x1f4a   :  { %v1168_v33 = vsel %vm1167_vm0, %v1382_v25, %v1164_v31 }
0x1f4b   :  { %v1173_v17 = vsel %vm1170_vm6, %v1172_v32, %v1168_v33 }
0x1f4c   :  { %v1175_v3 = vmul.f32 2.0, %v1173_v17  ;;  %v1177_v38 = vmul.f32 %v1173_v17, %v1123_v4 }
0x1f4e   :  { %v1280_v34 = vadd.f32 -1.0, %v1175_v3 }
0x1f50   :  { %1179 = vrot.lane.b32.xlu0 %v1280_v34, %s1387_s23 }
0x1f58   :  { %1197 = vrot.lane.b32.xlu0 %v1287_v35, %s1389_s4 }
0x1fc2   :  { %v1180_v36 = vpop.permute.xlu0 %1179 }
0x1fc3   :  { %v1182_v37 = vmul.f32 %v1180_v36, %v1173_v17 }
0x1fc5   :  { %1184 = vrot.lane.b32.xlu1 %v1182_v37, %s1388_s24 }
0x1fca   :  { %v1198_v43 = vpop.permute.xlu0 %1197 }
0x2037   :  { %v1185_v39 = vpop.permute.xlu1 %1184 }
0x2038   :  { %v1187_v40 = vadd.f32 %v1185_v39, %v1177_v38 }
0x203a   :  { %1383 = vtanh.f32 %v1187_v40 }
0x2040   :  { %v1384_v41 = vpop.eup %1383 }
0x2041   :  { %1190 = vrot.lane.b32.xlu2 %v1384_v41, %s1387_s23 }
0x209b   :  { %v1191_v42 = vpop.permute.xlu2 %1190 }
0x209c   :  { %v1193_v44 = vmul.f32 %v1191_v42, %v1173_v17 }
0x209e   :  { %v1200_v45 = vmul.f32 %v1198_v43, %v1193_v44 }
0x20a0   :  { %1202 = vrot.lane.b32.xlu1 %v1200_v45, %s1388_s24 }
0x2112   :  { %v1203_v47 = vpop.permute.xlu1 %1202 }
0x2113   :  { %v1205_v48 = vsel %vm118_vm5, %v1203_v47, 0.0 }
0x2114   :  { %1206 = vadd.xlane.f32.xlu2 %v1205_v48 }
0x2187   :  { %v1207_v50 = vpop.xlane.xlu2 %1206 }
0x2188   :  { %v1212_v51 = vadd.f32 %v1288_v49, %v1207_v50 }
0x218a   :  { %1214 = vst.msk [vmem:[%s1744_s9] sm:$0xff] %vm1213_vm7, %v1212_v51 }

</bundles_post_ra>
